<compile_context>
chip_gen: v7x
topology: tpu7x:2x2x1
jax: 0.10.0
libtpu: 0.0.40
codegen_flags: <defaults>
</compile_context>

<pallas_src>
import functools
import math

import jax
import jax.numpy as jnp
from jax import lax
from jax.experimental import pallas as pl
from jax.experimental.pallas import tpu as pltpu  # noqa: F401  (TPU backend import)

# ---- small, module-consistent sizes ----
BATCH = 2
SEQ = 8
NUM_HEADS = 4
HIDDEN = 32
INTER = 64
HEAD_DIM = HIDDEN // NUM_HEADS
LN_EPS = 1e-5
_INV_SQRT2 = 1.0 / math.sqrt(2.0)

# layers_setting: same [num_heads, hidden_dim, inter_dim] repeated -> shared layer applied N times
LAYERS_SETTING = [[NUM_HEADS, HIDDEN, INTER], [NUM_HEADS, HIDDEN, INTER]]


def _layernorm(x, w, b):
    mean = jnp.mean(x, axis=-1, keepdims=True)
    var = jnp.mean((x - mean) ** 2, axis=-1, keepdims=True)
    return (x - mean) * lax.rsqrt(var + LN_EPS) * w + b


def _gelu(x):
    # exact erf gelu as in the reference module
    return x * 0.5 * (1.0 + lax.erf(x * _INV_SQRT2))


# --------------------------- fused encoder kernel ---------------------------
def fused_encoder_kernel(x_ref, mask_ref,
                         wqkv_ref, bqkv_ref, wao_ref, bao_ref,
                         ln1w_ref, ln1b_ref, wi_ref, bi_ref,
                         wo_ref, bo_ref, ln2w_ref, ln2b_ref,
                         out_ref, *, num_layers):
    # Hoist the additive-mask broadcast out of the layer loop.
    mask2 = mask_ref[...]                                    # (B, S)
    mask_nss = [
        jnp.broadcast_to(mask2[b:b + 1].reshape(1, 1, SEQ), (NUM_HEADS, SEQ, SEQ))
        for b in range(BATCH)
    ]

    def one_layer(h):                                        # h: (B*S, H)
        # Fused Q|K|V projection: one (16,32)@(32,96) MXU push.
        # (Weights are re-read near use; VMEM loads are cheap, keeps regalloc pressure low.)
        qkv = jnp.dot(h, wqkv_ref[...],
                      preferred_element_type=jnp.float32) + bqkv_ref[...]   # (B*S, 3H)

        ctx_parts = []
        for b in range(BATCH):                               # B=2, static unroll
            qkv_b = qkv[b * SEQ:(b + 1) * SEQ]               # (S, 3H)
            # One combined head-split relayout for q,k,v: (S, 3N, D) -> (3N, S, D).
            qkv_h = qkv_b.reshape(SEQ, 3 * NUM_HEADS, HEAD_DIM).transpose(1, 0, 2)
            qh = qkv_h[:NUM_HEADS]                           # (N, S, D), scale folded in
            kh = qkv_h[NUM_HEADS:2 * NUM_HEADS]
            vh = qkv_h[2 * NUM_HEADS:]

            sc = jnp.einsum('nqd,nkd->nqk', qh, kh,
                            preferred_element_type=jnp.float32)             # (N, S, S)
            sc = sc + mask_nss[b]
            sc = sc - jnp.max(sc, axis=-1, keepdims=True)
            e = jnp.exp(sc)
            p = e * pl.reciprocal(jnp.sum(e, axis=-1, keepdims=True), approx=True)
            ctx = jnp.einsum('nqk,nkd->nqd', p, vh,
                             preferred_element_type=jnp.float32)            # (N, S, D)
            ctx_parts.append(ctx.transpose(1, 0, 2).reshape(SEQ, HIDDEN))   # concat heads
        ctx_all = jnp.concatenate(ctx_parts, axis=0)                        # (B*S, H)

        # attention output projection + residual + LayerNorm
        attn = jnp.dot(ctx_all, wao_ref[...],
                       preferred_element_type=jnp.float32) + bao_ref[...]
        h1 = _layernorm(attn + h, ln1w_ref[...], ln1b_ref[...])

        # intermediate (gelu) + output projection + residual + LayerNorm
        inter = _gelu(jnp.dot(h1, wi_ref[...],
                              preferred_element_type=jnp.float32) + bi_ref[...])
        out = jnp.dot(inter, wo_ref[...],
                      preferred_element_type=jnp.float32) + bo_ref[...]
        return _layernorm(out + h1, ln2w_ref[...], ln2b_ref[...])

    # ALBERT parameter sharing: the SAME weights applied num_layers times.
    # num_layers is static (=2) -> fully unrolled flat trace, no loop bookkeeping.
    h = x_ref[...]
    for _ in range(num_layers):
        h = one_layer(h)
    out_ref[...] = h


def sketch_al_encoder_pallas(input_states, attention_mask, params, num_layers):
    """input_states: [B, S, H]; attention_mask: [B, 1, 1, S] additive (PyTorch convention).

    Returns all_states containing only the final hidden state (output_all_states=False).
    """
    B, S, H = input_states.shape
    x2 = input_states.reshape(B * S, H).astype(jnp.float32)      # batch-folded slab
    mask2 = attention_mask.reshape(B, S).astype(jnp.float32)

    (wq, bq, wk, bk, wv, bv, wao, bao, ln1w, ln1b, wi, bi, wo, bo, ln2w, ln2b) = params
    inv_scale = 1.0 / math.sqrt(HEAD_DIM)
    # PyTorch (out,in) -> (in,out) once on the host; fold attention scale into Q; fuse Q|K|V.
    wqkv = jnp.concatenate([wq.T * inv_scale, wk.T, wv.T], axis=1)   # (H, 3H)
    bqkv = jnp.concatenate([bq * inv_scale, bk, bv], axis=1)          # (1, 3H)
    kparams = (wqkv, bqkv, wao.T, bao, ln1w, ln1b, wi.T, bi, wo.T, bo, ln2w, ln2b)

    kernel = functools.partial(fused_encoder_kernel, num_layers=num_layers)
    # Grid-less call: whole arrays live in VMEM (total footprint ~50 KiB), single launch.
    # (On v7x one could instead keep grid=(B,) "parallel" to split the 2 TensorCores, but
    #  at this size per-core launch overhead exceeds the split benefit.)
    out = pl.pallas_call(
        kernel,
        out_shape=jax.ShapeDtypeStruct((B * S, H), jnp.float32),
    )(x2, mask2, *kparams)
    return [out.reshape(B, S, H)]


# ---------------- pure-JAX reference (for verification) ----------------
def ref_layer(x, mask4, p):
    (wq, bq, wk, bk, wv, bv, wao, bao, ln1w, ln1b, wi, bi, wo, bo, ln2w, ln2b) = p
    B, S, H = x.shape
    q = jnp.einsum('bsh,oh->bso', x, wq) + bq[0]
    k = jnp.einsum('bsh,oh->bso', x, wk) + bk[0]
    v = jnp.einsum('bsh,oh->bso', x, wv) + bv[0]
    qh = q.reshape(B, S, NUM_HEADS, HEAD_DIM).transpose(0, 2, 1, 3)
    kh = k.reshape(B, S, NUM_HEADS, HEAD_DIM).transpose(0, 2, 1, 3)
    vh = v.reshape(B, S, NUM_HEADS, HEAD_DIM).transpose(0, 2, 1, 3)
    scores = jnp.einsum('bnqd,bnkd->bnqk', qh, kh) / math.sqrt(HEAD_DIM)
    scores = scores + mask4
    probs = jax.nn.softmax(scores, axis=-1)
    ctx = jnp.einsum('bnqk,bnkd->bnqd', probs, vh)
    ctx = ctx.transpose(0, 2, 1, 3).reshape(B, S, H)
    attn_out = jnp.einsum('bsh,oh->bso', ctx, wao) + bao[0]
    h1 = _layernorm(attn_out + x, ln1w[0], ln1b[0])
    inter = _gelu(jnp.einsum('bsh,ih->bsi', h1, wi) + bi[0])
    out = jnp.einsum('bsi,hi->bsh', inter, wo) + bo[0]
    return _layernorm(out + h1, ln2w[0], ln2b[0])


def ref_encoder(x, mask4, params, num_layers):
    for _ in range(num_layers):
        x = ref_layer(x, mask4, params)
    return x


# ---------------- deterministic parameter init (PyTorch-style (out, in) weights) ----------------
def init_params(key):
    ks = jax.random.split(key, 8)
    s = 0.02
    wq = s * jax.random.normal(ks[0], (HIDDEN, HIDDEN), jnp.float32)
    wk = s * jax.random.normal(ks[1], (HIDDEN, HIDDEN), jnp.float32)
    wv = s * jax.random.normal(ks[2], (HIDDEN, HIDDEN), jnp.float32)
    wao = s * jax.random.normal(ks[3], (HIDDEN, HIDDEN), jnp.float32)
    wi = s * jax.random.normal(ks[4], (INTER, HIDDEN), jnp.float32)
    wo = s * jax.random.normal(ks[5], (HIDDEN, INTER), jnp.float32)
    bq = 0.01 * jax.random.normal(ks[6], (1, HIDDEN), jnp.float32)
    bk = jnp.zeros((1, HIDDEN), jnp.float32)
    bv = 0.01 * jax.random.normal(ks[7], (1, HIDDEN), jnp.float32)
    bao = jnp.zeros((1, HIDDEN), jnp.float32)
    bi = jnp.zeros((1, INTER), jnp.float32)
    bo = jnp.zeros((1, HIDDEN), jnp.float32)
    ln1w = jnp.ones((1, HIDDEN), jnp.float32)
    ln1b = jnp.zeros((1, HIDDEN), jnp.float32)
    ln2w = jnp.ones((1, HIDDEN), jnp.float32)
    ln2b = jnp.zeros((1, HIDDEN), jnp.float32)
    return (wq, bq, wk, bk, wv, bv, wao, bao, ln1w, ln1b, wi, bi, wo, bo, ln2w, ln2b)


if __name__ == "__main__":
    key = jax.random.PRNGKey(0)
    kx, kp = jax.random.split(key)
    params = init_params(kp)

    x = jax.random.normal(kx, (BATCH, SEQ, HIDDEN), jnp.float32)
    # additive attention mask [B, 1, 1, S]: mask out the last two positions of batch 1
    mask4 = jnp.zeros((BATCH, 1, 1, SEQ), jnp.float32)
    mask4 = mask4.at[1, 0, 0, -2:].set(-10000.0)

    num_layers = len(LAYERS_SETTING)
    all_states = sketch_al_encoder_pallas(x, mask4, params, num_layers)
    out = jax.block_until_ready(all_states[-1])

    ref = jax.block_until_ready(ref_encoder(x, mask4, params, num_layers))
    assert out.shape == (BATCH, SEQ, HIDDEN)
    err = float(jnp.max(jnp.abs(out - ref)))
    # tolerance covers default MXU precision + approx (EUP) softmax reciprocal
    assert jnp.allclose(out, ref, atol=2e-3, rtol=2e-3), err

    print("KERNEL_OK")
</pallas_src>

<mosaic_0001>
module attributes {stable_mosaic.version = 11 : i64} {
  func.func @fused_encoder_kernel(%arg0: memref<16x32xf32, #tpu.memory_space<vmem>>, %arg1: memref<2x8xf32, #tpu.memory_space<vmem>>, %arg2: memref<32x96xf32, #tpu.memory_space<vmem>>, %arg3: memref<1x96xf32, #tpu.memory_space<vmem>>, %arg4: memref<32x32xf32, #tpu.memory_space<vmem>>, %arg5: memref<1x32xf32, #tpu.memory_space<vmem>>, %arg6: memref<1x32xf32, #tpu.memory_space<vmem>>, %arg7: memref<1x32xf32, #tpu.memory_space<vmem>>, %arg8: memref<32x64xf32, #tpu.memory_space<vmem>>, %arg9: memref<1x64xf32, #tpu.memory_space<vmem>>, %arg10: memref<64x32xf32, #tpu.memory_space<vmem>>, %arg11: memref<1x32xf32, #tpu.memory_space<vmem>>, %arg12: memref<1x32xf32, #tpu.memory_space<vmem>>, %arg13: memref<1x32xf32, #tpu.memory_space<vmem>>, %arg14: memref<16x32xf32, #tpu.memory_space<vmem>>) attributes {dimension_semantics = [], scalar_prefetch = 0 : i64, scratch_operands = 0 : i64, tpu.core_type = #tpu.core_type<tc>} {
    %c0 = arith.constant 0 : index
    %c0_0 = arith.constant 0 : index
    %0 = vector.load %arg1[%c0, %c0_0] : memref<2x8xf32, #tpu.memory_space<vmem>>, vector<2x8xf32>
    %1 = vector.extract_strided_slice %0 {offsets = [0, 0], sizes = [1, 8], strides = [1, 1]} : vector<2x8xf32> to vector<1x8xf32>
    %2 = vector.shape_cast %1 : vector<1x8xf32> to vector<1x1x8xf32>
    %3 = vector.shape_cast %2 : vector<1x1x8xf32> to vector<1x1x8xf32>
    %4 = vector.broadcast %3 : vector<1x1x8xf32> to vector<4x8x8xf32>
    %5 = vector.extract_strided_slice %0 {offsets = [1, 0], sizes = [1, 8], strides = [1, 1]} : vector<2x8xf32> to vector<1x8xf32>
    %6 = vector.shape_cast %5 : vector<1x8xf32> to vector<1x1x8xf32>
    %7 = vector.shape_cast %6 : vector<1x1x8xf32> to vector<1x1x8xf32>
    %8 = vector.broadcast %7 : vector<1x1x8xf32> to vector<4x8x8xf32>
    %c0_1 = arith.constant 0 : index
    %c0_2 = arith.constant 0 : index
    %9 = vector.load %arg0[%c0_1, %c0_2] : memref<16x32xf32, #tpu.memory_space<vmem>>, vector<16x32xf32>
    %c0_3 = arith.constant 0 : index
    %c0_4 = arith.constant 0 : index
    %10 = vector.load %arg2[%c0_3, %c0_4] : memref<32x96xf32, #tpu.memory_space<vmem>>, vector<32x96xf32>
    %cst = arith.constant dense<0.000000e+00> : vector<16x96xf32>
    %11 = tpu.matmul %9, %10, %cst {dimension_numbers = #tpu.dot_dimension_numbers<[1], [0], [0], [1], [0, 0, 1, 1], [], []>} : vector<16x32xf32>, vector<32x96xf32>, vector<16x96xf32> -> vector<16x96xf32>
    %c0_5 = arith.constant 0 : index
    %c0_6 = arith.constant 0 : index
    %12 = vector.load %arg3[%c0_5, %c0_6] : memref<1x96xf32, #tpu.memory_space<vmem>>, vector<1x96xf32>
    %13 = vector.broadcast %12 : vector<1x96xf32> to vector<16x96xf32>
    %14 = arith.addf %11, %13 : vector<16x96xf32>
    %15 = vector.extract_strided_slice %14 {offsets = [0, 0], sizes = [8, 96], strides = [1, 1]} : vector<16x96xf32> to vector<8x96xf32>
    %16 = vector.shape_cast %15 : vector<8x96xf32> to vector<8x12x8xf32>
    %17 = tpu.transpose %16, [1, 0, 2] : vector<8x12x8xf32> -> vector<12x8x8xf32>
    %18 = vector.extract_strided_slice %17 {offsets = [0, 0, 0], sizes = [4, 8, 8], strides = [1, 1, 1]} : vector<12x8x8xf32> to vector<4x8x8xf32>
    %19 = vector.extract_strided_slice %17 {offsets = [4, 0, 0], sizes = [4, 8, 8], strides = [1, 1, 1]} : vector<12x8x8xf32> to vector<4x8x8xf32>
    %20 = vector.extract_strided_slice %17 {offsets = [8, 0, 0], sizes = [4, 8, 8], strides = [1, 1, 1]} : vector<12x8x8xf32> to vector<4x8x8xf32>
    "tpu.trace_start"() <{level = 10 : i32, message = "nqd,nkd->nqk"}> : () -> ()
    %cst_7 = arith.constant dense<0.000000e+00> : vector<4x8x8xf32>
    %21 = tpu.matmul %18, %19, %cst_7 {dimension_numbers = #tpu.dot_dimension_numbers<[2], [2], [1], [1], [0, 0, 0, 1, 1, 1], [0], [0]>} : vector<4x8x8xf32>, vector<4x8x8xf32>, vector<4x8x8xf32> -> vector<4x8x8xf32>
    "tpu.trace_stop"() : () -> ()
    %22 = arith.addf %21, %4 : vector<4x8x8xf32>
    %cst_8 = arith.constant dense<0xFF800000> : vector<4x8xf32>
    %23 = vector.multi_reduction <maximumf>, %22, %cst_8 [2] : vector<4x8x8xf32> to vector<4x8xf32>
    %24 = vector.shape_cast %23 : vector<4x8xf32> to vector<4x8x1xf32>
    %25 = vector.broadcast %24 : vector<4x8x1xf32> to vector<4x8x8xf32>
    %26 = arith.subf %22, %25 : vector<4x8x8xf32>
    %27 = math.exp %26 : vector<4x8x8xf32>
    %cst_9 = arith.constant dense<0.000000e+00> : vector<4x8xf32>
    %28 = vector.multi_reduction <add>, %27, %cst_9 [2] : vector<4x8x8xf32> to vector<4x8xf32>
    %29 = vector.shape_cast %28 : vector<4x8xf32> to vector<4x8x1xf32>
    %30 = tpu.reciprocal %29 {approx = true} : vector<4x8x1xf32> -> vector<4x8x1xf32>
    %31 = vector.broadcast %30 : vector<4x8x1xf32> to vector<4x8x8xf32>
    %32 = arith.mulf %27, %31 : vector<4x8x8xf32>
    "tpu.trace_start"() <{level = 10 : i32, message = "nqk,nkd->nqd"}> : () -> ()
    %cst_10 = arith.constant dense<0.000000e+00> : vector<4x8x8xf32>
    %33 = tpu.matmul %32, %20, %cst_10 {dimension_numbers = #tpu.dot_dimension_numbers<[2], [1], [1], [2], [0, 0, 0, 1, 1, 2], [0], [0]>} : vector<4x8x8xf32>, vector<4x8x8xf32>, vector<4x8x8xf32> -> vector<4x8x8xf32>
    "tpu.trace_stop"() : () -> ()
    %34 = tpu.transpose %33, [1, 0, 2] : vector<4x8x8xf32> -> vector<8x4x8xf32>
    %35 = vector.shape_cast %34 : vector<8x4x8xf32> to vector<8x32xf32>
    %36 = vector.extract_strided_slice %14 {offsets = [8, 0], sizes = [8, 96], strides = [1, 1]} : vector<16x96xf32> to vector<8x96xf32>
    %37 = vector.shape_cast %36 : vector<8x96xf32> to vector<8x12x8xf32>
    %38 = tpu.transpose %37, [1, 0, 2] : vector<8x12x8xf32> -> vector<12x8x8xf32>
    %39 = vector.extract_strided_slice %38 {offsets = [0, 0, 0], sizes = [4, 8, 8], strides = [1, 1, 1]} : vector<12x8x8xf32> to vector<4x8x8xf32>
    %40 = vector.extract_strided_slice %38 {offsets = [4, 0, 0], sizes = [4, 8, 8], strides = [1, 1, 1]} : vector<12x8x8xf32> to vector<4x8x8xf32>
    %41 = vector.extract_strided_slice %38 {offsets = [8, 0, 0], sizes = [4, 8, 8], strides = [1, 1, 1]} : vector<12x8x8xf32> to vector<4x8x8xf32>
    "tpu.trace_start"() <{level = 10 : i32, message = "nqd,nkd->nqk"}> : () -> ()
    %cst_11 = arith.constant dense<0.000000e+00> : vector<4x8x8xf32>
    %42 = tpu.matmul %39, %40, %cst_11 {dimension_numbers = #tpu.dot_dimension_numbers<[2], [2], [1], [1], [0, 0, 0, 1, 1, 1], [0], [0]>} : vector<4x8x8xf32>, vector<4x8x8xf32>, vector<4x8x8xf32> -> vector<4x8x8xf32>
    "tpu.trace_stop"() : () -> ()
    %43 = arith.addf %42, %8 : vector<4x8x8xf32>
    %cst_12 = arith.constant dense<0xFF800000> : vector<4x8xf32>
    %44 = vector.multi_reduction <maximumf>, %43, %cst_12 [2] : vector<4x8x8xf32> to vector<4x8xf32>
    %45 = vector.shape_cast %44 : vector<4x8xf32> to vector<4x8x1xf32>
    %46 = vector.broadcast %45 : vector<4x8x1xf32> to vector<4x8x8xf32>
    %47 = arith.subf %43, %46 : vector<4x8x8xf32>
    %48 = math.exp %47 : vector<4x8x8xf32>
    %cst_13 = arith.constant dense<0.000000e+00> : vector<4x8xf32>
    %49 = vector.multi_reduction <add>, %48, %cst_13 [2] : vector<4x8x8xf32> to vector<4x8xf32>
    %50 = vector.shape_cast %49 : vector<4x8xf32> to vector<4x8x1xf32>
    %51 = tpu.reciprocal %50 {approx = true} : vector<4x8x1xf32> -> vector<4x8x1xf32>
    %52 = vector.broadcast %51 : vector<4x8x1xf32> to vector<4x8x8xf32>
    %53 = arith.mulf %48, %52 : vector<4x8x8xf32>
    "tpu.trace_start"() <{level = 10 : i32, message = "nqk,nkd->nqd"}> : () -> ()
    %cst_14 = arith.constant dense<0.000000e+00> : vector<4x8x8xf32>
    %54 = tpu.matmul %53, %41, %cst_14 {dimension_numbers = #tpu.dot_dimension_numbers<[2], [1], [1], [2], [0, 0, 0, 1, 1, 2], [0], [0]>} : vector<4x8x8xf32>, vector<4x8x8xf32>, vector<4x8x8xf32> -> vector<4x8x8xf32>
    "tpu.trace_stop"() : () -> ()
    %55 = tpu.transpose %54, [1, 0, 2] : vector<4x8x8xf32> -> vector<8x4x8xf32>
    %56 = vector.shape_cast %55 : vector<8x4x8xf32> to vector<8x32xf32>
    %57 = tpu.concatenate %35, %56 in 0 : vector<8x32xf32>, vector<8x32xf32> -> vector<16x32xf32>
    %c0_15 = arith.constant 0 : index
    %c0_16 = arith.constant 0 : index
    %58 = vector.load %arg4[%c0_15, %c0_16] : memref<32x32xf32, #tpu.memory_space<vmem>>, vector<32x32xf32>
    %cst_17 = arith.constant dense<0.000000e+00> : vector<16x32xf32>
    %59 = tpu.matmul %57, %58, %cst_17 {dimension_numbers = #tpu.dot_dimension_numbers<[1], [0], [0], [1], [0, 0, 1, 1], [], []>} : vector<16x32xf32>, vector<32x32xf32>, vector<16x32xf32> -> vector<16x32xf32>
    %c0_18 = arith.constant 0 : index
    %c0_19 = arith.constant 0 : index
    %60 = vector.load %arg5[%c0_18, %c0_19] : memref<1x32xf32, #tpu.memory_space<vmem>>, vector<1x32xf32>
    %61 = vector.broadcast %60 : vector<1x32xf32> to vector<16x32xf32>
    %62 = arith.addf %59, %61 : vector<16x32xf32>
    %63 = arith.addf %62, %9 : vector<16x32xf32>
    %c0_20 = arith.constant 0 : index
    %c0_21 = arith.constant 0 : index
    %64 = vector.load %arg6[%c0_20, %c0_21] : memref<1x32xf32, #tpu.memory_space<vmem>>, vector<1x32xf32>
    %c0_22 = arith.constant 0 : index
    %c0_23 = arith.constant 0 : index
    %65 = vector.load %arg7[%c0_22, %c0_23] : memref<1x32xf32, #tpu.memory_space<vmem>>, vector<1x32xf32>
    %cst_24 = arith.constant dense<0.000000e+00> : vector<16xf32>
    %66 = vector.multi_reduction <add>, %63, %cst_24 [1] : vector<16x32xf32> to vector<16xf32>
    %67 = vector.shape_cast %66 : vector<16xf32> to vector<16x1xf32>
    %cst_25 = arith.constant 3.200000e+01 : f32
    %68 = vector.broadcast %cst_25 : f32 to vector<16x1xf32>
    %69 = arith.divf %67, %68 : vector<16x1xf32>
    %70 = vector.broadcast %69 : vector<16x1xf32> to vector<16x32xf32>
    %71 = arith.subf %63, %70 : vector<16x32xf32>
    %72 = arith.mulf %71, %71 : vector<16x32xf32>
    %cst_26 = arith.constant dense<0.000000e+00> : vector<16xf32>
    %73 = vector.multi_reduction <add>, %72, %cst_26 [1] : vector<16x32xf32> to vector<16xf32>
    %74 = vector.shape_cast %73 : vector<16xf32> to vector<16x1xf32>
    %cst_27 = arith.constant 3.200000e+01 : f32
    %75 = vector.broadcast %cst_27 : f32 to vector<16x1xf32>
    %76 = arith.divf %74, %75 : vector<16x1xf32>
    %77 = vector.broadcast %69 : vector<16x1xf32> to vector<16x32xf32>
    %78 = arith.subf %63, %77 : vector<16x32xf32>
    %cst_28 = arith.constant 9.99999974E-6 : f32
    %79 = vector.broadcast %cst_28 : f32 to vector<16x1xf32>
    %80 = arith.addf %76, %79 : vector<16x1xf32>
    %81 = math.rsqrt %80 : vector<16x1xf32>
    %82 = vector.broadcast %81 : vector<16x1xf32> to vector<16x32xf32>
    %83 = arith.mulf %78, %82 : vector<16x32xf32>
    %84 = vector.broadcast %64 : vector<1x32xf32> to vector<16x32xf32>
    %85 = arith.mulf %83, %84 : vector<16x32xf32>
    %86 = vector.broadcast %65 : vector<1x32xf32> to vector<16x32xf32>
    %87 = arith.addf %85, %86 : vector<16x32xf32>
    %c0_29 = arith.constant 0 : index
    %c0_30 = arith.constant 0 : index
    %88 = vector.load %arg8[%c0_29, %c0_30] : memref<32x64xf32, #tpu.memory_space<vmem>>, vector<32x64xf32>
    %cst_31 = arith.constant dense<0.000000e+00> : vector<16x64xf32>
    %89 = tpu.matmul %87, %88, %cst_31 {dimension_numbers = #tpu.dot_dimension_numbers<[1], [0], [0], [1], [0, 0, 1, 1], [], []>} : vector<16x32xf32>, vector<32x64xf32>, vector<16x64xf32> -> vector<16x64xf32>
    %c0_32 = arith.constant 0 : index
    %c0_33 = arith.constant 0 : index
    %90 = vector.load %arg9[%c0_32, %c0_33] : memref<1x64xf32, #tpu.memory_space<vmem>>, vector<1x64xf32>
    %91 = vector.broadcast %90 : vector<1x64xf32> to vector<16x64xf32>
    %92 = arith.addf %89, %91 : vector<16x64xf32>
    %cst_34 = arith.constant 5.000000e-01 : f32
    %93 = vector.broadcast %cst_34 : f32 to vector<16x64xf32>
    %94 = arith.mulf %92, %93 : vector<16x64xf32>
    %cst_35 = arith.constant 0.707106769 : f32
    %95 = vector.broadcast %cst_35 : f32 to vector<16x64xf32>
    %96 = arith.mulf %92, %95 : vector<16x64xf32>
    %97 = math.erf %96 : vector<16x64xf32>
    %cst_36 = arith.constant 1.000000e+00 : f32
    %98 = vector.broadcast %cst_36 : f32 to vector<16x64xf32>
    %99 = arith.addf %98, %97 : vector<16x64xf32>
    %100 = arith.mulf %94, %99 : vector<16x64xf32>
    %c0_37 = arith.constant 0 : index
    %c0_38 = arith.constant 0 : index
    %101 = vector.load %arg10[%c0_37, %c0_38] : memref<64x32xf32, #tpu.memory_space<vmem>>, vector<64x32xf32>
    %cst_39 = arith.constant dense<0.000000e+00> : vector<16x32xf32>
    %102 = tpu.matmul %100, %101, %cst_39 {dimension_numbers = #tpu.dot_dimension_numbers<[1], [0], [0], [1], [0, 0, 1, 1], [], []>} : vector<16x64xf32>, vector<64x32xf32>, vector<16x32xf32> -> vector<16x32xf32>
    %c0_40 = arith.constant 0 : index
    %c0_41 = arith.constant 0 : index
    %103 = vector.load %arg11[%c0_40, %c0_41] : memref<1x32xf32, #tpu.memory_space<vmem>>, vector<1x32xf32>
    %104 = vector.broadcast %103 : vector<1x32xf32> to vector<16x32xf32>
    %105 = arith.addf %102, %104 : vector<16x32xf32>
    %106 = arith.addf %105, %87 : vector<16x32xf32>
    %c0_42 = arith.constant 0 : index
    %c0_43 = arith.constant 0 : index
    %107 = vector.load %arg12[%c0_42, %c0_43] : memref<1x32xf32, #tpu.memory_space<vmem>>, vector<1x32xf32>
    %c0_44 = arith.constant 0 : index
    %c0_45 = arith.constant 0 : index
    %108 = vector.load %arg13[%c0_44, %c0_45] : memref<1x32xf32, #tpu.memory_space<vmem>>, vector<1x32xf32>
    %cst_46 = arith.constant dense<0.000000e+00> : vector<16xf32>
    %109 = vector.multi_reduction <add>, %106, %cst_46 [1] : vector<16x32xf32> to vector<16xf32>
    %110 = vector.shape_cast %109 : vector<16xf32> to vector<16x1xf32>
    %cst_47 = arith.constant 3.200000e+01 : f32
    %111 = vector.broadcast %cst_47 : f32 to vector<16x1xf32>
    %112 = arith.divf %110, %111 : vector<16x1xf32>
    %113 = vector.broadcast %112 : vector<16x1xf32> to vector<16x32xf32>
    %114 = arith.subf %106, %113 : vector<16x32xf32>
    %115 = arith.mulf %114, %114 : vector<16x32xf32>
    %cst_48 = arith.constant dense<0.000000e+00> : vector<16xf32>
    %116 = vector.multi_reduction <add>, %115, %cst_48 [1] : vector<16x32xf32> to vector<16xf32>
    %117 = vector.shape_cast %116 : vector<16xf32> to vector<16x1xf32>
    %cst_49 = arith.constant 3.200000e+01 : f32
    %118 = vector.broadcast %cst_49 : f32 to vector<16x1xf32>
    %119 = arith.divf %117, %118 : vector<16x1xf32>
    %120 = vector.broadcast %112 : vector<16x1xf32> to vector<16x32xf32>
    %121 = arith.subf %106, %120 : vector<16x32xf32>
    %cst_50 = arith.constant 9.99999974E-6 : f32
    %122 = vector.broadcast %cst_50 : f32 to vector<16x1xf32>
    %123 = arith.addf %119, %122 : vector<16x1xf32>
    %124 = math.rsqrt %123 : vector<16x1xf32>
    %125 = vector.broadcast %124 : vector<16x1xf32> to vector<16x32xf32>
    %126 = arith.mulf %121, %125 : vector<16x32xf32>
    %127 = vector.broadcast %107 : vector<1x32xf32> to vector<16x32xf32>
    %128 = arith.mulf %126, %127 : vector<16x32xf32>
    %129 = vector.broadcast %108 : vector<1x32xf32> to vector<16x32xf32>
    %130 = arith.addf %128, %129 : vector<16x32xf32>
    %c0_51 = arith.constant 0 : index
    %c0_52 = arith.constant 0 : index
    %131 = vector.load %arg2[%c0_51, %c0_52] : memref<32x96xf32, #tpu.memory_space<vmem>>, vector<32x96xf32>
    %cst_53 = arith.constant dense<0.000000e+00> : vector<16x96xf32>
    %132 = tpu.matmul %130, %131, %cst_53 {dimension_numbers = #tpu.dot_dimension_numbers<[1], [0], [0], [1], [0, 0, 1, 1], [], []>} : vector<16x32xf32>, vector<32x96xf32>, vector<16x96xf32> -> vector<16x96xf32>
    %c0_54 = arith.constant 0 : index
    %c0_55 = arith.constant 0 : index
    %133 = vector.load %arg3[%c0_54, %c0_55] : memref<1x96xf32, #tpu.memory_space<vmem>>, vector<1x96xf32>
    %134 = vector.broadcast %133 : vector<1x96xf32> to vector<16x96xf32>
    %135 = arith.addf %132, %134 : vector<16x96xf32>
    %136 = vector.extract_strided_slice %135 {offsets = [0, 0], sizes = [8, 96], strides = [1, 1]} : vector<16x96xf32> to vector<8x96xf32>
    %137 = vector.shape_cast %136 : vector<8x96xf32> to vector<8x12x8xf32>
    %138 = tpu.transpose %137, [1, 0, 2] : vector<8x12x8xf32> -> vector<12x8x8xf32>
    %139 = vector.extract_strided_slice %138 {offsets = [0, 0, 0], sizes = [4, 8, 8], strides = [1, 1, 1]} : vector<12x8x8xf32> to vector<4x8x8xf32>
    %140 = vector.extract_strided_slice %138 {offsets = [4, 0, 0], sizes = [4, 8, 8], strides = [1, 1, 1]} : vector<12x8x8xf32> to vector<4x8x8xf32>
    %141 = vector.extract_strided_slice %138 {offsets = [8, 0, 0], sizes = [4, 8, 8], strides = [1, 1, 1]} : vector<12x8x8xf32> to vector<4x8x8xf32>
    "tpu.trace_start"() <{level = 10 : i32, message = "nqd,nkd->nqk"}> : () -> ()
    %cst_56 = arith.constant dense<0.000000e+00> : vector<4x8x8xf32>
    %142 = tpu.matmul %139, %140, %cst_56 {dimension_numbers = #tpu.dot_dimension_numbers<[2], [2], [1], [1], [0, 0, 0, 1, 1, 1], [0], [0]>} : vector<4x8x8xf32>, vector<4x8x8xf32>, vector<4x8x8xf32> -> vector<4x8x8xf32>
    "tpu.trace_stop"() : () -> ()
    %143 = arith.addf %142, %4 : vector<4x8x8xf32>
    %cst_57 = arith.constant dense<0xFF800000> : vector<4x8xf32>
    %144 = vector.multi_reduction <maximumf>, %143, %cst_57 [2] : vector<4x8x8xf32> to vector<4x8xf32>
    %145 = vector.shape_cast %144 : vector<4x8xf32> to vector<4x8x1xf32>
    %146 = vector.broadcast %145 : vector<4x8x1xf32> to vector<4x8x8xf32>
    %147 = arith.subf %143, %146 : vector<4x8x8xf32>
    %148 = math.exp %147 : vector<4x8x8xf32>
    %cst_58 = arith.constant dense<0.000000e+00> : vector<4x8xf32>
    %149 = vector.multi_reduction <add>, %148, %cst_58 [2] : vector<4x8x8xf32> to vector<4x8xf32>
    %150 = vector.shape_cast %149 : vector<4x8xf32> to vector<4x8x1xf32>
    %151 = tpu.reciprocal %150 {approx = true} : vector<4x8x1xf32> -> vector<4x8x1xf32>
    %152 = vector.broadcast %151 : vector<4x8x1xf32> to vector<4x8x8xf32>
    %153 = arith.mulf %148, %152 : vector<4x8x8xf32>
    "tpu.trace_start"() <{level = 10 : i32, message = "nqk,nkd->nqd"}> : () -> ()
    %cst_59 = arith.constant dense<0.000000e+00> : vector<4x8x8xf32>
    %154 = tpu.matmul %153, %141, %cst_59 {dimension_numbers = #tpu.dot_dimension_numbers<[2], [1], [1], [2], [0, 0, 0, 1, 1, 2], [0], [0]>} : vector<4x8x8xf32>, vector<4x8x8xf32>, vector<4x8x8xf32> -> vector<4x8x8xf32>
    "tpu.trace_stop"() : () -> ()
    %155 = tpu.transpose %154, [1, 0, 2] : vector<4x8x8xf32> -> vector<8x4x8xf32>
    %156 = vector.shape_cast %155 : vector<8x4x8xf32> to vector<8x32xf32>
    %157 = vector.extract_strided_slice %135 {offsets = [8, 0], sizes = [8, 96], strides = [1, 1]} : vector<16x96xf32> to vector<8x96xf32>
    %158 = vector.shape_cast %157 : vector<8x96xf32> to vector<8x12x8xf32>
    %159 = tpu.transpose %158, [1, 0, 2] : vector<8x12x8xf32> -> vector<12x8x8xf32>
    %160 = vector.extract_strided_slice %159 {offsets = [0, 0, 0], sizes = [4, 8, 8], strides = [1, 1, 1]} : vector<12x8x8xf32> to vector<4x8x8xf32>
    %161 = vector.extract_strided_slice %159 {offsets = [4, 0, 0], sizes = [4, 8, 8], strides = [1, 1, 1]} : vector<12x8x8xf32> to vector<4x8x8xf32>
    %162 = vector.extract_strided_slice %159 {offsets = [8, 0, 0], sizes = [4, 8, 8], strides = [1, 1, 1]} : vector<12x8x8xf32> to vector<4x8x8xf32>
    "tpu.trace_start"() <{level = 10 : i32, message = "nqd,nkd->nqk"}> : () -> ()
    %cst_60 = arith.constant dense<0.000000e+00> : vector<4x8x8xf32>
    %163 = tpu.matmul %160, %161, %cst_60 {dimension_numbers = #tpu.dot_dimension_numbers<[2], [2], [1], [1], [0, 0, 0, 1, 1, 1], [0], [0]>} : vector<4x8x8xf32>, vector<4x8x8xf32>, vector<4x8x8xf32> -> vector<4x8x8xf32>
    "tpu.trace_stop"() : () -> ()
    %164 = arith.addf %163, %8 : vector<4x8x8xf32>
    %cst_61 = arith.constant dense<0xFF800000> : vector<4x8xf32>
    %165 = vector.multi_reduction <maximumf>, %164, %cst_61 [2] : vector<4x8x8xf32> to vector<4x8xf32>
    %166 = vector.shape_cast %165 : vector<4x8xf32> to vector<4x8x1xf32>
    %167 = vector.broadcast %166 : vector<4x8x1xf32> to vector<4x8x8xf32>
    %168 = arith.subf %164, %167 : vector<4x8x8xf32>
    %169 = math.exp %168 : vector<4x8x8xf32>
    %cst_62 = arith.constant dense<0.000000e+00> : vector<4x8xf32>
    %170 = vector.multi_reduction <add>, %169, %cst_62 [2] : vector<4x8x8xf32> to vector<4x8xf32>
    %171 = vector.shape_cast %170 : vector<4x8xf32> to vector<4x8x1xf32>
    %172 = tpu.reciprocal %171 {approx = true} : vector<4x8x1xf32> -> vector<4x8x1xf32>
    %173 = vector.broadcast %172 : vector<4x8x1xf32> to vector<4x8x8xf32>
    %174 = arith.mulf %169, %173 : vector<4x8x8xf32>
    "tpu.trace_start"() <{level = 10 : i32, message = "nqk,nkd->nqd"}> : () -> ()
    %cst_63 = arith.constant dense<0.000000e+00> : vector<4x8x8xf32>
    %175 = tpu.matmul %174, %162, %cst_63 {dimension_numbers = #tpu.dot_dimension_numbers<[2], [1], [1], [2], [0, 0, 0, 1, 1, 2], [0], [0]>} : vector<4x8x8xf32>, vector<4x8x8xf32>, vector<4x8x8xf32> -> vector<4x8x8xf32>
    "tpu.trace_stop"() : () -> ()
    %176 = tpu.transpose %175, [1, 0, 2] : vector<4x8x8xf32> -> vector<8x4x8xf32>
    %177 = vector.shape_cast %176 : vector<8x4x8xf32> to vector<8x32xf32>
    %178 = tpu.concatenate %156, %177 in 0 : vector<8x32xf32>, vector<8x32xf32> -> vector<16x32xf32>
    %c0_64 = arith.constant 0 : index
    %c0_65 = arith.constant 0 : index
    %179 = vector.load %arg4[%c0_64, %c0_65] : memref<32x32xf32, #tpu.memory_space<vmem>>, vector<32x32xf32>
    %cst_66 = arith.constant dense<0.000000e+00> : vector<16x32xf32>
    %180 = tpu.matmul %178, %179, %cst_66 {dimension_numbers = #tpu.dot_dimension_numbers<[1], [0], [0], [1], [0, 0, 1, 1], [], []>} : vector<16x32xf32>, vector<32x32xf32>, vector<16x32xf32> -> vector<16x32xf32>
    %c0_67 = arith.constant 0 : index
    %c0_68 = arith.constant 0 : index
    %181 = vector.load %arg5[%c0_67, %c0_68] : memref<1x32xf32, #tpu.memory_space<vmem>>, vector<1x32xf32>
    %182 = vector.broadcast %181 : vector<1x32xf32> to vector<16x32xf32>
    %183 = arith.addf %180, %182 : vector<16x32xf32>
    %184 = arith.addf %183, %130 : vector<16x32xf32>
    %c0_69 = arith.constant 0 : index
    %c0_70 = arith.constant 0 : index
    %185 = vector.load %arg6[%c0_69, %c0_70] : memref<1x32xf32, #tpu.memory_space<vmem>>, vector<1x32xf32>
    %c0_71 = arith.constant 0 : index
    %c0_72 = arith.constant 0 : index
    %186 = vector.load %arg7[%c0_71, %c0_72] : memref<1x32xf32, #tpu.memory_space<vmem>>, vector<1x32xf32>
    %cst_73 = arith.constant dense<0.000000e+00> : vector<16xf32>
    %187 = vector.multi_reduction <add>, %184, %cst_73 [1] : vector<16x32xf32> to vector<16xf32>
    %188 = vector.shape_cast %187 : vector<16xf32> to vector<16x1xf32>
    %cst_74 = arith.constant 3.200000e+01 : f32
    %189 = vector.broadcast %cst_74 : f32 to vector<16x1xf32>
    %190 = arith.divf %188, %189 : vector<16x1xf32>
    %191 = vector.broadcast %190 : vector<16x1xf32> to vector<16x32xf32>
    %192 = arith.subf %184, %191 : vector<16x32xf32>
    %193 = arith.mulf %192, %192 : vector<16x32xf32>
    %cst_75 = arith.constant dense<0.000000e+00> : vector<16xf32>
    %194 = vector.multi_reduction <add>, %193, %cst_75 [1] : vector<16x32xf32> to vector<16xf32>
    %195 = vector.shape_cast %194 : vector<16xf32> to vector<16x1xf32>
    %cst_76 = arith.constant 3.200000e+01 : f32
    %196 = vector.broadcast %cst_76 : f32 to vector<16x1xf32>
    %197 = arith.divf %195, %196 : vector<16x1xf32>
    %198 = vector.broadcast %190 : vector<16x1xf32> to vector<16x32xf32>
    %199 = arith.subf %184, %198 : vector<16x32xf32>
    %cst_77 = arith.constant 9.99999974E-6 : f32
    %200 = vector.broadcast %cst_77 : f32 to vector<16x1xf32>
    %201 = arith.addf %197, %200 : vector<16x1xf32>
    %202 = math.rsqrt %201 : vector<16x1xf32>
    %203 = vector.broadcast %202 : vector<16x1xf32> to vector<16x32xf32>
    %204 = arith.mulf %199, %203 : vector<16x32xf32>
    %205 = vector.broadcast %185 : vector<1x32xf32> to vector<16x32xf32>
    %206 = arith.mulf %204, %205 : vector<16x32xf32>
    %207 = vector.broadcast %186 : vector<1x32xf32> to vector<16x32xf32>
    %208 = arith.addf %206, %207 : vector<16x32xf32>
    %c0_78 = arith.constant 0 : index
    %c0_79 = arith.constant 0 : index
    %209 = vector.load %arg8[%c0_78, %c0_79] : memref<32x64xf32, #tpu.memory_space<vmem>>, vector<32x64xf32>
    %cst_80 = arith.constant dense<0.000000e+00> : vector<16x64xf32>
    %210 = tpu.matmul %208, %209, %cst_80 {dimension_numbers = #tpu.dot_dimension_numbers<[1], [0], [0], [1], [0, 0, 1, 1], [], []>} : vector<16x32xf32>, vector<32x64xf32>, vector<16x64xf32> -> vector<16x64xf32>
    %c0_81 = arith.constant 0 : index
    %c0_82 = arith.constant 0 : index
    %211 = vector.load %arg9[%c0_81, %c0_82] : memref<1x64xf32, #tpu.memory_space<vmem>>, vector<1x64xf32>
    %212 = vector.broadcast %211 : vector<1x64xf32> to vector<16x64xf32>
    %213 = arith.addf %210, %212 : vector<16x64xf32>
    %cst_83 = arith.constant 5.000000e-01 : f32
    %214 = vector.broadcast %cst_83 : f32 to vector<16x64xf32>
    %215 = arith.mulf %213, %214 : vector<16x64xf32>
    %cst_84 = arith.constant 0.707106769 : f32
    %216 = vector.broadcast %cst_84 : f32 to vector<16x64xf32>
    %217 = arith.mulf %213, %216 : vector<16x64xf32>
    %218 = math.erf %217 : vector<16x64xf32>
    %cst_85 = arith.constant 1.000000e+00 : f32
    %219 = vector.broadcast %cst_85 : f32 to vector<16x64xf32>
    %220 = arith.addf %219, %218 : vector<16x64xf32>
    %221 = arith.mulf %215, %220 : vector<16x64xf32>
    %c0_86 = arith.constant 0 : index
    %c0_87 = arith.constant 0 : index
    %222 = vector.load %arg10[%c0_86, %c0_87] : memref<64x32xf32, #tpu.memory_space<vmem>>, vector<64x32xf32>
    %cst_88 = arith.constant dense<0.000000e+00> : vector<16x32xf32>
    %223 = tpu.matmul %221, %222, %cst_88 {dimension_numbers = #tpu.dot_dimension_numbers<[1], [0], [0], [1], [0, 0, 1, 1], [], []>} : vector<16x64xf32>, vector<64x32xf32>, vector<16x32xf32> -> vector<16x32xf32>
    %c0_89 = arith.constant 0 : index
    %c0_90 = arith.constant 0 : index
    %224 = vector.load %arg11[%c0_89, %c0_90] : memref<1x32xf32, #tpu.memory_space<vmem>>, vector<1x32xf32>
    %225 = vector.broadcast %224 : vector<1x32xf32> to vector<16x32xf32>
    %226 = arith.addf %223, %225 : vector<16x32xf32>
    %227 = arith.addf %226, %208 : vector<16x32xf32>
    %c0_91 = arith.constant 0 : index
    %c0_92 = arith.constant 0 : index
    %228 = vector.load %arg12[%c0_91, %c0_92] : memref<1x32xf32, #tpu.memory_space<vmem>>, vector<1x32xf32>
    %c0_93 = arith.constant 0 : index
    %c0_94 = arith.constant 0 : index
    %229 = vector.load %arg13[%c0_93, %c0_94] : memref<1x32xf32, #tpu.memory_space<vmem>>, vector<1x32xf32>
    %cst_95 = arith.constant dense<0.000000e+00> : vector<16xf32>
    %230 = vector.multi_reduction <add>, %227, %cst_95 [1] : vector<16x32xf32> to vector<16xf32>
    %231 = vector.shape_cast %230 : vector<16xf32> to vector<16x1xf32>
    %cst_96 = arith.constant 3.200000e+01 : f32
    %232 = vector.broadcast %cst_96 : f32 to vector<16x1xf32>
    %233 = arith.divf %231, %232 : vector<16x1xf32>
    %234 = vector.broadcast %233 : vector<16x1xf32> to vector<16x32xf32>
    %235 = arith.subf %227, %234 : vector<16x32xf32>
    %236 = arith.mulf %235, %235 : vector<16x32xf32>
    %cst_97 = arith.constant dense<0.000000e+00> : vector<16xf32>
    %237 = vector.multi_reduction <add>, %236, %cst_97 [1] : vector<16x32xf32> to vector<16xf32>
    %238 = vector.shape_cast %237 : vector<16xf32> to vector<16x1xf32>
    %cst_98 = arith.constant 3.200000e+01 : f32
    %239 = vector.broadcast %cst_98 : f32 to vector<16x1xf32>
    %240 = arith.divf %238, %239 : vector<16x1xf32>
    %241 = vector.broadcast %233 : vector<16x1xf32> to vector<16x32xf32>
    %242 = arith.subf %227, %241 : vector<16x32xf32>
    %cst_99 = arith.constant 9.99999974E-6 : f32
    %243 = vector.broadcast %cst_99 : f32 to vector<16x1xf32>
    %244 = arith.addf %240, %243 : vector<16x1xf32>
    %245 = math.rsqrt %244 : vector<16x1xf32>
    %246 = vector.broadcast %245 : vector<16x1xf32> to vector<16x32xf32>
    %247 = arith.mulf %242, %246 : vector<16x32xf32>
    %248 = vector.broadcast %228 : vector<1x32xf32> to vector<16x32xf32>
    %249 = arith.mulf %247, %248 : vector<16x32xf32>
    %250 = vector.broadcast %229 : vector<1x32xf32> to vector<16x32xf32>
    %251 = arith.addf %249, %250 : vector<16x32xf32>
    %c0_100 = arith.constant 0 : index
    %c0_101 = arith.constant 0 : index
    %252 = vector.load %arg14[%c0_100, %c0_101] : memref<16x32xf32, #tpu.memory_space<vmem>>, vector<16x32xf32>
    tpu.vector_store %arg14[%c0_100, %c0_101], %251 {strides = array<i32>} : memref<16x32xf32, #tpu.memory_space<vmem>>, vector<16x32xf32>,
    return
  }
}

</mosaic_0001>

<bundles_post_ra>
// kernel: tpu_custom_call.1
= control target key start
LH: loop header
LB: loop body
LE: loop exit
PB: predicated region body
PF: predicated region fallthrough
CT: control target
= control target key end

     0   :  { %19 = vsyncpa [#allocation3], 0  ;;  %s7897_s0 = inlined_call_operand.hbm [shape: f32[16,32], index: 0, kind: input, shape index: {}]   ;;  %s7898_s1 = inlined_call_operand.vmem [shape: f32[2,8], index: 1, kind: input, shape index: {}]   ;;  %s7899_s2 = inlined_call_operand.vmem [shape: f32[32,96], index: 2, kind: input, shape index: {}]   ;;  %s7900_s3 = inlined_call_operand.vmem [shape: f32[1,96], index: 3, kind: input, shape index: {}]   ;;  %s7901_s4 = inlined_call_operand.vmem [shape: f32[32,32], index: 4, kind: input, shape index: {}]   ;;  %s7902_s5 = inlined_call_operand.vmem [shape: f32[1,32], index: 5, kind: input, shape index: {}]   ;;  %s7903_s6 = inlined_call_operand.vmem [shape: f32[1,32], index: 6, kind: input, shape index: {}]   ;;  %s7904_s7 = inlined_call_operand.hbm [shape: f32[1,32], index: 7, kind: input, shape index: {}]   ;;  %s7905_s8 = inlined_call_operand.vmem [shape: f32[32,64], index: 8, kind: input, shape index: {}]   ;;  %s7906_s9 = inlined_call_operand.hbm [shape: f32[1,64], index: 9, kind: input, shape index: {}]   ;;  %s7907_s10 = inlined_call_operand.vmem [shape: f32[64,32], index: 10, kind: input, shape index: {}]   ;;  %s7908_s11 = inlined_call_operand.vmem [shape: f32[1,32], index: 11, kind: input, shape index: {}]   ;;  %s7909_s12 = inlined_call_operand.vmem [shape: f32[1,32], index: 12, kind: input, shape index: {}]   ;;  %s7910_s13 = inlined_call_operand.vmem [shape: f32[1,32], index: 13, kind: input, shape index: {}]   ;;  %s7911_s14 = inlined_call_operand.hbm [shape: f32[16,32], index: 14, kind: output, shape index: {}]  }
   0x1   :  { %20 = vsyncpa [#allocation6], 0 }
   0x2   :  { %21 = vsyncpa [#allocation4], 0  ;;  %s6801_s29 = smov [#allocation5]   ;;  %s6802_s15 = smov [#allocation2]  }
   0x3   :  { %s52_s30 = sshll.u32 %s6801_s29, 4  ;;  %s27_s16 = sshll.u32 %s6802_s15, 4  ;;  %s53_s30 = int_to_ptr.vmem [resolvable:$true] %s52_s30  ;;  %s6899_s16 = int_to_ptr.vmem [resolvable:$true] %s27_s16 }
   0x4   :  { %s6707_s19 = scalar_lea.hbm %s7904_s7, 16 }
   0x5   :  { %p6708_p0 = scmp.ne.s32.totalorder %s7904_s7, %s6707_s19  ;;  %p6711_p1 = scmp.lt.u32.totalorder %s6707_s19, %s7904_s7 }
   0x7   :  { %p6713_p2 = pnand %p6711_p1, %p6708_p0 }
   0x9   :  { %6716 = shalt.err (!%p6713_p2)
}
   0xa   :  { %s6717_s24 = scalar_lea.vmem %s53_s30, 16  ;;  %s6721_s25 = scalar_lea.vmem %s53_s30, 32 }
   0xb   :  { %p6718_p3 = scmp.ne.s32.totalorder %s53_s30, %s6717_s24  ;;  %p6722_p4 = scmp.lt.s32.totalorder %s53_s30, %s53_s30 }
   0xc   :  { %p6723_p5 = scmp.lt.s32.totalorder %s6721_s25, %s6717_s24 }
   0xe   :  { %p6724_p6 = por %p6723_p5, %p6722_p4 }
  0x10   :  { %p6725_p7 = pnand %p6724_p6, %p6718_p3 }
  0x12   :  { %6728 = shalt.err (!%p6725_p7)
}
  0x13   :  { %55 = dma.hbm_to_vmem [thread:$0]  %s7904_s7, 16, %s53_s30, [#allocation6]  }
  0x14   :  { %s6729_s15 = scalar_lea.hbm %s7897_s0, 256 }
  0x15   :  { %p6730_p8 = scmp.ne.s32.totalorder %s7897_s0, %s6729_s15  ;;  %p6733_p9 = scmp.lt.u32.totalorder %s6729_s15, %s7897_s0 }
  0x17   :  { %p6735_p10 = pnand %p6733_p9, %p6730_p8 }
  0x19   :  { %6738 = shalt.err (!%p6735_p10)
}
  0x1a   :  { %s6739_s21 = scalar_lea.vmem %s6899_s16, 256  ;;  %p6744_p12 = scmp.lt.s32.totalorder %s6899_s16, %s6899_s16 }
  0x1b   :  { %p6740_p11 = scmp.ne.s32.totalorder %s6899_s16, %s6739_s21  ;;  %p6745_p13 = scmp.lt.s32.totalorder %s6739_s21, %s6739_s21 }
  0x1d   :  { %p6746_p0 = por %p6745_p13, %p6744_p12 }
  0x1f   :  { %p6747_p1 = pnand %p6746_p0, %p6740_p11 }
  0x21   :  { %6750 = shalt.err (!%p6747_p1)
}
  0x22   :  { %s7912_s7 = smov 128   ;;  %s7913_s30 = smov 8  }
  0x23   :  { %33 = dma.hbm_to_vmem [thread:$0]  %s7897_s0, 256, %s6899_s16, [#allocation3], %s7912_s7, %s7912_s7, %s7913_s30  }
  0x24   :  { %s6805_s24 = smov [#allocation7]   ;;  %s6751_s28 = scalar_lea.hbm %s7906_s9, 16 }
  0x25   :  { %s64_s25 = sshll.u32 %s6805_s24, 4  ;;  %p6752_p2 = scmp.ne.s32.totalorder %s7906_s9, %s6751_s28  ;;  %s65_s25 = int_to_ptr.vmem [resolvable:$true] %s64_s25 }
  0x26   :  { %p6755_p3 = scmp.lt.u32.totalorder %s6751_s28, %s7906_s9 }
  0x28   :  { %p6757_p4 = pnand %p6755_p3, %p6752_p2 }
  0x2a   :  { %6760 = shalt.err (!%p6757_p4)
}
  0x2b   :  { %s6761_s19 = scalar_lea.vmem %s65_s25, 16  ;;  %s6765_s0 = scalar_lea.vmem %s65_s25, 32 }
  0x2c   :  { %p6762_p5 = scmp.ne.s32.totalorder %s65_s25, %s6761_s19  ;;  %p6766_p6 = scmp.lt.s32.totalorder %s65_s25, %s65_s25 }
  0x2d   :  { %p6767_p7 = scmp.lt.s32.totalorder %s6765_s0, %s6761_s19 }
  0x2f   :  { %p6768_p8 = por %p6767_p7, %p6766_p6 }
  0x31   :  { %p6769_p9 = pnand %p6768_p8, %p6762_p5 }
  0x33   :  { %6772 = shalt.err (!%p6769_p9)
}
  0x34   :  { %67 = dma.hbm_to_vmem [thread:$0]  %s7906_s9, 16, %s65_s25, [#allocation6]  }
  0x35   :  { %6795 = dma.done.wait [#allocation3], 256  }
  0x36   :  { %6796 = vsyncadd [#allocation3], 4294967040 }
  0x37   :  { %6797 = dma.done.wait [#allocation6], 32  }
  0x38   :  { %6798 = vsyncadd [#allocation6], 4294967264  ;;  %vm107_vm0 = vcmask 261120   ;;  %v96_v0 = vld [vmem:[%s7899_s2] sm:$0xff]  ;;  %v97_v1 = vld [vmem:[%s7899_s2 + $0x8] sm:$0xff]  ;;  %s6806_s15 = smov 80   ;;  %v86_v14 = vlaneseq }
  0x39   :  { %v98_v2 = vld [vmem:[%s7899_s2 + $0x10] sm:$0xff]  ;;  %v6514_v3 = vpack.c.bf16 %v97_v1, %v96_v0  ;;  %v99_v4 = vld [vmem:[%s7899_s2 + $0x18] sm:$0xff]  ;;  %v94_v5 = vld [vmem:[#allocation2] sm:$0xff]  ;;  %s6807_s17 = smov 96   ;;  %s6808_s18 = smov 72   ;;  %v6812_v13 = vmov 0.0  }
  0x3a   :  { %v6518_v6 = vpack.c.bf16 %v99_v4, %v98_v2  ;;  %6258 = vmatprep.mubr.msk.f32.mxu1 %vm107_vm0, %v94_v5  ;;  %v95_v7 = vld [vmem:[#allocation2 + $0x8] sm:$0xff]  ;;  %v6002_v8 = vld [vmem:[%s7900_s3] ss:$0 sm:$0xff]  ;;  %s6809_s19 = smov 88   ;;  %s6810_s0 = smov 112   ;;  %6271 = vmatprep.subr.mxu0 %v6812_v13  ;;  %vm6814_vm1 = vmmov 0  }
  0x3b   :  { %6515 = vmatprep.subr.bf16.mxu1 %v6514_v3  ;;  %s6811_s16 = smov 120   ;;  %s6813_s20 = smov 104   ;;  %6273 = vmatprep.mubr.msk.f32.mxu0 %vm6814_vm1, %v6812_v13  ;;  %v6815_v15 = vmov 1983009808   ;;  %v6816_v17 = vmov 1934713408  }
  0x3c   :  { %6517 = vmatpush3.bf16.msra.mxu1 %v6514_v3  ;;  %v226_v16 = vunpack.c.l.s4 %v6815_v15  ;;  %v290_v18 = vunpack.c.l.s4 %v6816_v17  ;;  %v6986_v19 = vshrl.u32 %v86_v14, 7  ;;  %vm631_vm2 = vcmask 64512   ;;  %s6818_s23 = smov 48   ;;  %s6819_s24 = smov 64  }
  0x3d   :  { %6519 = vmatprep.subr.bf16.mxu1 %v6518_v6  ;;  %s6820_s26 = smov 40   ;;  %s6821_s27 = smov 16   ;;  %vm1421_vm3 = vcmask 130048   ;;  %vm1423_vm4 = vcmask 195584   ;;  %vm2914_vm5 = vcmask 523264  }
  0x3e   :  { %v227_v20 = vunpack.c.0.s8 %v226_v16  ;;  %v291_v23 = vunpack.c.0.s8 %v290_v18  ;;  %s7915_s28 = smov 24  }
  0x40   :  { %6521 = vmatpush3.bf16.msra.mxu1 %v6518_v6  ;;  %v6989_v24 = vsub.s32 %v227_v20, %v6986_v19  ;;  %v6992_v31 = vsub.s32 %v291_v23, %v6986_v19 }
  0x41   :  { %6261 = vmatprep.subr.mxu1 %v6812_v13 }
  0x43   :  { %6259 = vmatmul.mubr.msk.f32.vlgmr.msra.gmra.mrb[0].mxu1 %vm107_vm0, %v95_v7 }
  0x44   :  { %6263 = vmatprep.mubr.msk.f32.mxu1 %vm6814_vm1, %v6812_v13 }
 0x116   :  { %v6260_v9 = vpop.f32.mrb[0].mxu1 }
 0x117   :  { %v6962_v10 = vadd.f32 %v6260_v9, %v6002_v8  ;;  %v180_v11 = vpop.f32.mrb[1].mxu1 }
 0x118   :  { %v6964_v12 = vadd.f32 %v6002_v8, %v180_v11 }
 0x11a   :  { %205 = vrot.lane.b32.xlu1 %v6964_v12, %s6806_s15  ;;  %199 = vrot.lane.b32.xlu0 %v6964_v12, %s6807_s17 }
 0x11e   :  { %208 = vrot.lane.b32.xlu1 %v6964_v12, %s6808_s18  ;;  %202 = vrot.lane.b32.xlu0 %v6964_v12, %s6809_s19 }
 0x122   :  { %193 = vrot.lane.b32.xlu1 %v6964_v12, %s6810_s0  ;;  %190 = vrot.lane.b32.xlu0 %v6964_v12, %s6811_s16 }
 0x126   :  { %196 = vrot.lane.b32.xlu0 %v6964_v12, %s6813_s20 }
 0x18c   :  { %v206_v21 = vpop.permute.xlu1 %205  ;;  %v200_v22 = vpop.permute.xlu0 %199 }
 0x18d   :  { %v255_v25 = vcombine.low %v200_v22, %v206_v21  ;;  %v256_v26 = vcombine.high %v200_v22, %v206_v21 }
 0x18f   :  { %v263_v32 = vrot.slane %v255_v25, %v6989_v24  ;;  %v270_v33 = vrot.slane %v256_v26, %v6989_v24 }
 0x190   :  { %v209_v27 = vpop.permute.xlu1 %208  ;;  %v203_v28 = vpop.permute.xlu0 %202 }
 0x191   :  { %v271_v29 = vcombine.low %v203_v28, %v209_v27  ;;  %v272_v30 = vcombine.high %v203_v28, %v209_v27 }
 0x193   :  { %v279_v34 = vrot.slane %v271_v29, %v6989_v24  ;;  %v286_v35 = vrot.slane %v272_v30, %v6989_v24 }
 0x194   :  { %v191_v36 = vpop.permute.xlu0 %190  ;;  %v194_v41 = vpop.permute.xlu1 %193 }
 0x195   :  { %v319_v37 = vcombine.low %v263_v32, %v279_v34  ;;  %v320_v38 = vcombine.high %v263_v32, %v279_v34  ;;  %v335_v39 = vcombine.low %v270_v33, %v286_v35  ;;  %v336_v40 = vcombine.high %v270_v33, %v286_v35 }
 0x196   :  { %v223_v46 = vcombine.low %v6964_v12, %v194_v41  ;;  %v224_v47 = vcombine.high %v6964_v12, %v194_v41 }
 0x197   :  { %v327_v42 = vrot.slane %v319_v37, %v6992_v31  ;;  %v334_v43 = vrot.slane %v320_v38, %v6992_v31  ;;  %v343_v44 = vrot.slane %v335_v39, %v6992_v31  ;;  %v350_v45 = vrot.slane %v336_v40, %v6992_v31 }
 0x198   :  { %v197_v48 = vpop.permute.xlu0 %196  ;;  %v231_v59 = vrot.slane %v223_v46, %v6989_v24  ;;  %v238_v60 = vrot.slane %v224_v47, %v6989_v24  ;;  %v7052_v46 = vld [vmem:[%s7898_s1] sm:$0x3]  ;;  %s6817_s1 = smov 56  }
 0x199   :  { %v6006_v49 = vcombine.low %v327_v42, %v334_v43  ;;  %v6008_v50 = vcombine.high %v327_v42, %v334_v43  ;;  %v6010_v51 = vcombine.low %v343_v44, %v350_v45  ;;  %v6012_v52 = vcombine.high %v343_v44, %v350_v45 }
 0x19a   :  { %v239_v53 = vcombine.low %v191_v36, %v197_v48  ;;  %v240_v54 = vcombine.high %v191_v36, %v197_v48  ;;  %v88_v45 = vsub.s32 0, %v6986_v19 }
 0x19b   :  { %v442_v55 = vrot.slane %v6006_v49, %v6989_v24  ;;  %v458_v56 = vrot.slane %v6008_v50, %v6989_v24  ;;  %v474_v57 = vrot.slane %v6010_v51, %v6989_v24  ;;  %v490_v58 = vrot.slane %v6012_v52, %v6989_v24 }
 0x19c   :  { %v247_v61 = vrot.slane %v239_v53, %v6989_v24  ;;  %v254_v62 = vrot.slane %v240_v54, %v6989_v24  ;;  %v7055_v47 = vrot.slane %v7052_v46, %v88_v45 }
 0x19d   :  { %v507_v63 = vcombine.low %v442_v55, %v458_v56  ;;  %v539_v0 = vcombine.low %v474_v57, %v490_v58  ;;  %v508_v1 = vcombine.high %v442_v55, %v458_v56  ;;  %v540_v2 = vcombine.high %v474_v57, %v490_v58 }
 0x19e   :  { %v287_v3 = vcombine.low %v231_v59, %v247_v61  ;;  %v288_v4 = vcombine.high %v231_v59, %v247_v61  ;;  %v303_v5 = vcombine.low %v238_v60, %v254_v62  ;;  %v304_v6 = vcombine.high %v238_v60, %v254_v62 }
 0x19f   :  { %v515_v7 = vrot.slane %v507_v63, %v6992_v31  ;;  %v547_v8 = vrot.slane %v539_v0, %v6992_v31  ;;  %v522_v9 = vrot.slane %v508_v1, %v6992_v31  ;;  %v554_v11 = vrot.slane %v540_v2, %v6992_v31 }
 0x1a0   :  { %v295_v14 = vrot.slane %v287_v3, %v6992_v31  ;;  %v302_v15 = vrot.slane %v288_v4, %v6992_v31  ;;  %v311_v16 = vrot.slane %v303_v5, %v6992_v31  ;;  %v318_v17 = vrot.slane %v304_v6, %v6992_v31 }
 0x1a1   :  { %v559_v18 = vcombine.low %v515_v7, %v547_v8  ;;  %v561_v20 = vcombine.low %v522_v9, %v554_v11  ;;  %v560_v41 = vcombine.high %v515_v7, %v547_v8  ;;  %v562_v43 = vcombine.high %v522_v9, %v554_v11 }
 0x1a2   :  { %v6005_v21 = vcombine.low %v295_v14, %v302_v15  ;;  %v6007_v22 = vcombine.high %v295_v14, %v302_v15  ;;  %v6009_v23 = vcombine.low %v311_v16, %v318_v17  ;;  %v6011_v25 = vcombine.high %v311_v16, %v318_v17 }
 0x1a3   :  { %6262 = vmatpush3.xpose.msk.msra.mxu1 %vm631_vm2, %v559_v18  ;;  %6272 = vmatpush3.xpose.msk.msra.mxu0 %vm631_vm2, %v561_v20 }
 0x1a4   :  { %v435_v26 = vrot.slane %v6005_v21, %v6989_v24  ;;  %v451_v27 = vrot.slane %v6007_v22, %v6989_v24  ;;  %v467_v28 = vrot.slane %v6009_v23, %v6989_v24  ;;  %v483_v29 = vrot.slane %v6011_v25, %v6989_v24  ;;  %6266 = vmatprep.subr.mxu1 %v6812_v13 }
 0x1a5   :  { %6281 = vmatprep.subr.mxu0 %v6812_v13 }
 0x1a6   :  { %v491_v30 = vcombine.low %v435_v26, %v451_v27  ;;  %v523_v32 = vcombine.low %v467_v28, %v483_v29  ;;  %v492_v33 = vcombine.high %v435_v26, %v451_v27  ;;  %v524_v34 = vcombine.high %v467_v28, %v483_v29 }
 0x1a8   :  { %v499_v35 = vrot.slane %v491_v30, %v6992_v31  ;;  %v531_v36 = vrot.slane %v523_v32, %v6992_v31  ;;  %v506_v37 = vrot.slane %v492_v33, %v6992_v31  ;;  %v538_v38 = vrot.slane %v524_v34, %v6992_v31 }
 0x1aa   :  { %v555_v39 = vcombine.low %v499_v35, %v531_v36  ;;  %v557_v40 = vcombine.low %v506_v37, %v538_v38  ;;  %v556_v42 = vcombine.high %v499_v35, %v531_v36  ;;  %v558_v44 = vcombine.high %v506_v37, %v538_v38 }
 0x1ac   :  { %6264 = vmatmul.mubr.msk.f32.vlgmr.msra.gmra.mrb[2].mxu1 %vm631_vm2, %v555_v39  ;;  %6274 = vmatmul.mubr.msk.f32.vlgmr.msra.gmra.mrb[0].mxu0 %vm631_vm2, %v557_v40 }
 0x1ad   :  { %6267 = vmatpush3.xpose.msk.msra.mxu1 %vm631_vm2, %v560_v41  ;;  %6268 = vmatprep.mubr.msk.f32.mxu1 %vm6814_vm1, %v6812_v13 }
 0x1ae   :  { %6276 = vmatprep.subr.mxu1 %v6812_v13  ;;  %6283 = vmatprep.mubr.msk.f32.mxu0 %vm6814_vm1, %v6812_v13 }
 0x1b0   :  { %6269 = vmatmul.mubr.msk.f32.vlgmr.msra.gmra.mrb[4].mxu1 %vm631_vm2, %v556_v42 }
 0x1b1   :  { %6277 = vmatpush3.xpose.msk.msra.mxu1 %vm631_vm2, %v562_v43  ;;  %6278 = vmatprep.mubr.msk.f32.mxu1 %vm6814_vm1, %v6812_v13 }
 0x1b2   :  { %6286 = vmatprep.subr.mxu1 %v6812_v13 }
 0x1b4   :  { %6279 = vmatmul.mubr.msk.f32.vlgmr.msra.gmra.mrb[6].mxu1 %vm631_vm2, %v558_v44 }
 0x1b5   :  { %6288 = vmatprep.mubr.msk.f32.mxu1 %vm6814_vm1, %v6812_v13 }
 0x27f   :  { %v704_v48 = vpop.f32.mrb[2].mxu1  ;;  %v856_v49 = vpop.f32.mrb[0].mxu0 }
 0x280   :  { %v705_v50 = vadd.f32 %v704_v48, %v7055_v47  ;;  %v6265_v51 = vpop.f32.mrb[3].mxu1  ;;  %v6275_v52 = vpop.f32.mrb[1].mxu0  ;;  %v857_v57 = vadd.f32 %v856_v49, %v7055_v47 }
 0x282   :  { %v936_v53 = vsel %vm631_vm2, %v705_v50, -inf  ;;  %v942_v61 = vsel %vm631_vm2, %v857_v57, -inf }
 0x283   :  { %v780_v54 = vpop.f32.mrb[4].mxu1  ;;  %937 = vmax.xlane.f32.xlu1 %v936_v53 }
 0x284   :  { %v781_v55 = vadd.f32 %v780_v54, %v7055_v47  ;;  %v6270_v56 = vpop.f32.mrb[5].mxu1 }
 0x286   :  { %v939_v58 = vsel %vm631_vm2, %v781_v55, -inf }
 0x287   :  { %v932_v59 = vpop.f32.mrb[6].mxu1  ;;  %940 = vmax.xlane.f32.xlu0 %v939_v58 }
 0x288   :  { %v6280_v60 = vpop.f32.mrb[7].mxu1  ;;  %v7076_v62 = vadd.f32 %v932_v59, %v7055_v47 }
 0x28a   :  { %v945_v63 = vsel %vm631_vm2, %v7076_v62, -inf }
 0x28b   :  { %943 = vmax.xlane.f32.xlu0 %v942_v61 }
 0x294   :  { %214 = vrot.lane.b32.xlu1 %v6964_v12, %s6817_s1 }
 0x298   :  { %217 = vrot.lane.b32.xlu1 %v6964_v12, %s6818_s23 }
 0x2a1   :  { %211 = vrot.lane.b32.xlu0 %v6964_v12, %s6819_s24 }
 0x2a5   :  { %220 = vrot.lane.b32.xlu0 %v6964_v12, %s6820_s26 }
 0x2a9   :  { %1438 = vrot.lane.b32.xlu0 %v6962_v10, %s6809_s19 }
 0x2ad   :  { %1444 = vrot.lane.b32.xlu0 %v6962_v10, %s6808_s18 }
 0x2bc   :  { %946 = vmax.xlane.f32.xlu1 %v945_v63 }
 0x2cd   :  { %1435 = vrot.lane.b32.xlu1 %v6962_v10, %s6807_s17 }
 0x2d1   :  { %1441 = vrot.lane.b32.xlu1 %v6962_v10, %s6806_s15 }
 0x2d5   :  { %1426 = vrot.lane.b32.xlu1 %v6962_v10, %s6811_s16 }
 0x310   :  { %v938_v12 = vpop.xlane.xlu1 %937 }
 0x311   :  { %v948_v0 = vsub.f32 %v705_v50, %v938_v12 }
 0x313   :  { %v952_v1 = vmul.f32 1.442695, %v948_v0 }
 0x314   :  { %v941_v2 = vpop.xlane.xlu0 %940  ;;  %v215_v5 = vpop.permute.xlu1 %214 }
 0x315   :  { %6617 = vpow2.f32 %v952_v1  ;;  %v949_v3 = vsub.f32 %v781_v55, %v941_v2 }
 0x317   :  { %v954_v4 = vmul.f32 1.442695, %v949_v3 }
 0x318   :  { %v944_v6 = vpop.xlane.xlu0 %943  ;;  %v218_v11 = vpop.permute.xlu1 %217 }
 0x319   :  { %6619 = vpow2.f32 %v954_v4  ;;  %v950_v7 = vsub.f32 %v857_v57, %v944_v6 }
 0x31b   :  { %v956_v8 = vmul.f32 1.442695, %v950_v7 }
 0x31c   :  { %v212_v9 = vpop.permute.xlu0 %211 }
 0x31d   :  { %6621 = vpow2.f32 %v956_v8  ;;  %v359_v15 = vcombine.low %v212_v9, %v218_v11  ;;  %v360_v16 = vcombine.high %v212_v9, %v218_v11 }
 0x31f   :  { %v7086_v14 = vpop.eup %6617  ;;  %v367_v23 = vrot.slane %v359_v15, %v6989_v24  ;;  %v374_v25 = vrot.slane %v360_v16, %v6989_v24 }
 0x320   :  { %v221_v17 = vpop.permute.xlu0 %220  ;;  %v960_v18 = vsel %vm631_vm2, %v7086_v14, 0.0 }
 0x321   :  { %v375_v20 = vcombine.low %v215_v5, %v221_v17  ;;  %v376_v21 = vcombine.high %v215_v5, %v221_v17  ;;  %961 = vadd.xlane.f32.xlu0 %v960_v18 }
 0x323   :  { %v7090_v22 = vpop.eup %6619  ;;  %v383_v26 = vrot.slane %v375_v20, %v6989_v24  ;;  %v390_v27 = vrot.slane %v376_v21, %v6989_v24 }
 0x324   :  { %v963_v28 = vsel %vm631_vm2, %v7090_v22, 0.0  ;;  %v1439_v4 = vpop.permute.xlu0 %1438 }
 0x325   :  { %v391_v29 = vcombine.low %v367_v23, %v383_v26  ;;  %v392_v30 = vcombine.high %v367_v23, %v383_v26  ;;  %v407_v32 = vcombine.low %v374_v25, %v390_v27  ;;  %v408_v33 = vcombine.high %v374_v25, %v390_v27  ;;  %964 = vadd.xlane.f32.xlu1 %v963_v28 }
 0x327   :  { %v7098_v34 = vpop.eup %6621  ;;  %v399_v35 = vrot.slane %v391_v29, %v6992_v31  ;;  %v406_v36 = vrot.slane %v392_v30, %v6992_v31  ;;  %v415_v37 = vrot.slane %v407_v32, %v6992_v31  ;;  %v422_v38 = vrot.slane %v408_v33, %v6992_v31 }
 0x328   :  { %v966_v39 = vsel %vm631_vm2, %v7098_v34, 0.0  ;;  %v1445_v6 = vpop.permute.xlu0 %1444 }
 0x329   :  { %v563_v40 = vcombine.low %v399_v35, %v406_v36  ;;  %v6013_v41 = vcombine.high %v399_v35, %v406_v36  ;;  %v579_v42 = vcombine.low %v415_v37, %v422_v38  ;;  %v6014_v43 = vcombine.high %v415_v37, %v422_v38  ;;  %967 = vadd.xlane.f32.xlu0 %v966_v39 }
 0x32a   :  { %v1507_v9 = vcombine.low %v1439_v4, %v1445_v6  ;;  %v1508_v11 = vcombine.high %v1439_v4, %v1445_v6 }
 0x32b   :  { %v570_v44 = vrot.slane %v563_v40, %v6989_v24  ;;  %v578_v45 = vrot.slane %v6013_v41, %v6989_v24  ;;  %v586_v48 = vrot.slane %v579_v42, %v6989_v24  ;;  %v594_v49 = vrot.slane %v6014_v43, %v6989_v24 }
 0x32c   :  { %v1515_v16 = vrot.slane %v1507_v9, %v6989_v24  ;;  %v1522_v17 = vrot.slane %v1508_v11, %v6989_v24 }
 0x32d   :  { %v595_v50 = vcombine.low %v570_v44, %v578_v45  ;;  %v611_v51 = vcombine.low %v586_v48, %v594_v49  ;;  %v596_v52 = vcombine.high %v570_v44, %v578_v45  ;;  %v612_v53 = vcombine.high %v586_v48, %v594_v49 }
 0x32f   :  { %v603_v54 = vrot.slane %v595_v50, %v6992_v31  ;;  %v619_v55 = vrot.slane %v611_v51, %v6992_v31  ;;  %v7113_v56 = vrot.slane %v596_v52, %v6992_v31  ;;  %v7116_v57 = vrot.slane %v612_v53, %v6992_v31 }
 0x331   :  { %v627_v58 = vcombine.low %v603_v54, %v619_v55  ;;  %v628_v59 = vcombine.high %v603_v54, %v619_v55  ;;  %v629_v60 = vcombine.low %v7113_v56, %v7116_v57  ;;  %v630_v61 = vcombine.high %v7113_v56, %v7116_v57 }
 0x333   :  { %6282 = vmatpush3.msra.mxu0 %v627_v58  ;;  %6287 = vmatpush3.msra.mxu1 %v628_v59 }
 0x334   :  { %6291 = vmatprep.subr.mxu0 %v6812_v13  ;;  %6296 = vmatprep.subr.mxu1 %v6812_v13 }
 0x33f   :  { %1429 = vrot.lane.b32.xlu0 %v6962_v10, %s6810_s0 }
 0x349   :  { %v947_v63 = vpop.xlane.xlu1 %946 }
 0x34a   :  { %v951_v12 = vsub.f32 %v7076_v62, %v947_v63 }
 0x34c   :  { %v958_v0 = vmul.f32 1.442695, %v951_v12 }
 0x34d   :  { %v1436_v3 = vpop.permute.xlu1 %1435 }
 0x34e   :  { %6623 = vpow2.f32 %v958_v0 }
 0x351   :  { %v1442_v5 = vpop.permute.xlu1 %1441 }
 0x352   :  { %v1491_v7 = vcombine.low %v1436_v3, %v1442_v5  ;;  %v1492_v8 = vcombine.high %v1436_v3, %v1442_v5 }
 0x354   :  { %v1499_v62 = vrot.slane %v1491_v7, %v6989_v24  ;;  %v1506_v15 = vrot.slane %v1492_v8, %v6989_v24 }
 0x355   :  { %v1427_v27 = vpop.permute.xlu1 %1426 }
 0x356   :  { %v1555_v18 = vcombine.low %v1499_v62, %v1515_v16  ;;  %v1556_v20 = vcombine.high %v1499_v62, %v1515_v16  ;;  %v1571_v21 = vcombine.low %v1506_v15, %v1522_v17  ;;  %v1572_v23 = vcombine.high %v1506_v15, %v1522_v17 }
 0x358   :  { %v7127_v1 = vpop.eup %6623  ;;  %v1563_v25 = vrot.slane %v1555_v18, %v6992_v31  ;;  %v1570_v26 = vrot.slane %v1556_v20, %v6992_v31  ;;  %v1579_v29 = vrot.slane %v1571_v21, %v6992_v31  ;;  %v1586_v30 = vrot.slane %v1572_v23, %v6992_v31 }
 0x359   :  { %v969_v2 = vsel %vm631_vm2, %v7127_v1, 0.0 }
 0x35a   :  { %970 = vadd.xlane.f32.xlu1 %v969_v2  ;;  %v6030_v32 = vcombine.low %v1563_v25, %v1570_v26  ;;  %v6032_v35 = vcombine.high %v1563_v25, %v1570_v26  ;;  %v6034_v36 = vcombine.low %v1579_v29, %v1586_v30  ;;  %v6036_v37 = vcombine.high %v1579_v29, %v1586_v30 }
 0x35c   :  { %v7142_v38 = vrot.slane %v6030_v32, %v6989_v24  ;;  %v7145_v40 = vrot.slane %v6032_v35, %v6989_v24  ;;  %v7148_v41 = vrot.slane %v6034_v36, %v6989_v24  ;;  %v7151_v42 = vrot.slane %v6036_v37, %v6989_v24 }
 0x35e   :  { %v1743_v45 = vcombine.low %v7142_v38, %v7145_v40  ;;  %v1775_v48 = vcombine.low %v7148_v41, %v7151_v42  ;;  %v1744_v20 = vcombine.high %v7142_v38, %v7145_v40  ;;  %v1776_v21 = vcombine.high %v7148_v41, %v7151_v42 }
 0x360   :  { %v1751_v51 = vrot.slane %v1743_v45, %v6992_v31  ;;  %v1758_v32 = vrot.slane %v1744_v20, %v6992_v31 }
 0x36b   :  { %1432 = vrot.lane.b32.xlu1 %v6962_v10, %s6813_s20 }
 0x3ae   :  { %v962_v28 = vpop.xlane.xlu0 %961 }
 0x3af   :  { %6625 = vrcp.f32 %v962_v28 }
 0x3b2   :  { %v965_v33 = vpop.xlane.xlu1 %964 }
 0x3b3   :  { %6627 = vrcp.f32 %v965_v33  ;;  %v1790_v33 = vrot.slane %v1776_v21, %v6992_v31 }
 0x3b5   :  { %v1797_v41 = vcombine.low %v1758_v32, %v1790_v33  ;;  %v1798_v42 = vcombine.high %v1758_v32, %v1790_v33 }
 0x3b6   :  { %v968_v39 = vpop.xlane.xlu0 %967 }
 0x3b7   :  { %6629 = vrcp.f32 %v968_v39 }
 0x3b9   :  { %v6626_v43 = vpop.eup %6625 }
 0x3ba   :  { %v976_v44 = vmul.f32 %v6626_v43, %v7086_v14  ;;  %v1783_v14 = vrot.slane %v1775_v48, %v6992_v31 }
 0x3bc   :  { %6284 = vmatmul.mubr.msk.f32.vlgmr.msra.gmra.mrb[2].mxu0 %vm631_vm2, %v976_v44  ;;  %v1795_v54 = vcombine.low %v1751_v51, %v1783_v14  ;;  %v1796_v62 = vcombine.high %v1751_v51, %v1783_v14 }
 0x3bd   :  { %v6628_v49 = vpop.eup %6627  ;;  %6292 = vmatpush3.msra.mxu0 %v629_v60  ;;  %6293 = vmatprep.mubr.msk.f32.mxu0 %vm6814_vm1, %v6812_v13 }
 0x3be   :  { %v977_v50 = vmul.f32 %v6628_v49, %v7090_v22  ;;  %6301 = vmatprep.subr.mxu0 %v6812_v13  ;;  %v1430_v22 = vpop.permute.xlu0 %1429 }
 0x3bf   :  { %v1459_v56 = vcombine.low %v6962_v10, %v1430_v22  ;;  %v1460_v57 = vcombine.high %v6962_v10, %v1430_v22 }
 0x3c0   :  { %6289 = vmatmul.mubr.msk.f32.vlgmr.msra.gmra.mrb[8].mxu1 %vm631_vm2, %v977_v50 }
 0x3c1   :  { %v6630_v52 = vpop.eup %6629  ;;  %6297 = vmatpush3.msra.mxu1 %v630_v61  ;;  %6298 = vmatprep.mubr.msk.f32.mxu1 %vm6814_vm1, %v6812_v13  ;;  %v1467_v60 = vrot.slane %v1459_v56, %v6989_v24  ;;  %v1474_v61 = vrot.slane %v1460_v57, %v6989_v24  ;;  %v92_v57 = vsub.s32 1, %v6986_v19 }
 0x3c2   :  { %v978_v53 = vmul.f32 %v6630_v52, %v7098_v34  ;;  %6306 = vmatprep.subr.mxu1 %v6812_v13 }
 0x3c4   :  { %6294 = vmatmul.mubr.msk.f32.vlgmr.msra.gmra.mrb[4].mxu0 %vm631_vm2, %v978_v53 }
 0x3c5   :  { %6302 = vmatpush3.xpose.msk.msra.mxu0 %vm631_vm2, %v1795_v54  ;;  %6303 = vmatprep.mubr.msk.f32.mxu0 %vm6814_vm1, %v6812_v13 }
 0x3c6   :  { %6311 = vmatprep.subr.mxu0 %v6812_v13 }
 0x3e7   :  { %v971_v55 = vpop.xlane.xlu1 %970 }
 0x3e8   :  { %6631 = vrcp.f32 %v971_v55 }
 0x3eb   :  { %v1433_v34 = vpop.permute.xlu1 %1432 }
 0x3ec   :  { %v1475_v58 = vcombine.low %v1427_v27, %v1433_v34  ;;  %v1476_v59 = vcombine.high %v1427_v27, %v1433_v34 }
 0x3ee   :  { %v1483_v63 = vrot.slane %v1475_v58, %v6989_v24  ;;  %v1490_v12 = vrot.slane %v1476_v59, %v6989_v24 }
 0x3f0   :  { %v1523_v0 = vcombine.low %v1467_v60, %v1483_v63  ;;  %v1524_v2 = vcombine.high %v1467_v60, %v1483_v63  ;;  %v1539_v3 = vcombine.low %v1474_v61, %v1490_v12  ;;  %v1540_v4 = vcombine.high %v1474_v61, %v1490_v12 }
 0x3f2   :  { %v6632_v5 = vpop.eup %6631  ;;  %v1531_v6 = vrot.slane %v1523_v0, %v6992_v31  ;;  %v1538_v7 = vrot.slane %v1524_v2, %v6992_v31  ;;  %v1547_v8 = vrot.slane %v1539_v3, %v6992_v31  ;;  %v1554_v9 = vrot.slane %v1540_v4, %v6992_v31 }
 0x3f3   :  { %v979_v11 = vmul.f32 %v6632_v5, %v7127_v1  ;;  %v7227_v2 = vrot.slane %v7052_v46, %v92_v57 }
 0x3f4   :  { %v6029_v15 = vcombine.low %v1531_v6, %v1538_v7  ;;  %v6031_v16 = vcombine.high %v1531_v6, %v1538_v7  ;;  %v6033_v17 = vcombine.low %v1547_v8, %v1554_v9  ;;  %v6035_v18 = vcombine.high %v1547_v8, %v1554_v9 }
 0x3f5   :  { %6299 = vmatmul.mubr.msk.f32.vlgmr.msra.gmra.mrb[10].mxu1 %vm631_vm2, %v979_v11 }
 0x3f6   :  { %v1671_v23 = vrot.slane %v6029_v15, %v6989_v24  ;;  %v1687_v25 = vrot.slane %v6031_v16, %v6989_v24  ;;  %v1703_v26 = vrot.slane %v6033_v17, %v6989_v24  ;;  %v1719_v1 = vrot.slane %v6035_v18, %v6989_v24  ;;  %6307 = vmatpush3.xpose.msk.msra.mxu1 %vm631_vm2, %v1796_v62 }
 0x3f7   :  { %6308 = vmatprep.mubr.msk.f32.mxu1 %vm6814_vm1, %v6812_v13  ;;  %6316 = vmatprep.subr.mxu1 %v6812_v13 }
 0x3f8   :  { %v1727_v27 = vcombine.low %v1671_v23, %v1687_v25  ;;  %v1728_v28 = vcombine.high %v1671_v23, %v1687_v25  ;;  %v1759_v29 = vcombine.low %v1703_v26, %v1719_v1  ;;  %v1760_v30 = vcombine.high %v1703_v26, %v1719_v1 }
 0x3fa   :  { %v1735_v35 = vrot.slane %v1727_v27, %v6992_v31  ;;  %v1767_v36 = vrot.slane %v1759_v29, %v6992_v31  ;;  %v1742_v39 = vrot.slane %v1728_v28, %v6992_v31  ;;  %v1774_v40 = vrot.slane %v1760_v30, %v6992_v31 }
 0x3fc   :  { %v1791_v37 = vcombine.low %v1735_v35, %v1767_v36  ;;  %v1792_v38 = vcombine.high %v1735_v35, %v1767_v36  ;;  %v1793_v43 = vcombine.low %v1742_v39, %v1774_v40  ;;  %v1794_v44 = vcombine.high %v1742_v39, %v1774_v40 }
 0x3fe   :  { %6304 = vmatmul.mubr.msk.f32.vlgmr.msra.gmra.mrb[6].mxu0 %vm631_vm2, %v1791_v37  ;;  %6309 = vmatmul.mubr.msk.f32.vlgmr.msra.gmra.mrb[12].mxu1 %vm631_vm2, %v1792_v38 }
 0x3ff   :  { %6312 = vmatpush3.xpose.msk.msra.mxu0 %vm631_vm2, %v1797_v41  ;;  %6317 = vmatpush3.xpose.msk.msra.mxu1 %vm631_vm2, %v1798_v42 }
 0x400   :  { %6313 = vmatprep.mubr.msk.f32.mxu0 %vm6814_vm1, %v6812_v13  ;;  %6318 = vmatprep.mubr.msk.f32.mxu1 %vm6814_vm1, %v6812_v13 }
 0x401   :  { %6321 = vmatprep.subr.mxu0 %v6812_v13  ;;  %6326 = vmatprep.subr.mxu1 %v6812_v13 }
 0x402   :  { %6314 = vmatmul.mubr.msk.f32.vlgmr.msra.gmra.mrb[8].mxu0 %vm631_vm2, %v1793_v43  ;;  %6319 = vmatmul.mubr.msk.f32.vlgmr.msra.gmra.mrb[14].mxu1 %vm631_vm2, %v1794_v44 }
 0x403   :  { %6323 = vmatprep.mubr.msk.f32.mxu0 %vm6814_vm1, %v6812_v13  ;;  %6328 = vmatprep.mubr.msk.f32.mxu1 %vm6814_vm1, %v6812_v13 }
 0x48f   :  { %v1049_v45 = vpop.f32.mrb[2].mxu0 }
 0x490   :  { %v6285_v48 = vpop.f32.mrb[3].mxu0 }
 0x493   :  { %v1122_v49 = vpop.f32.mrb[8].mxu1 }
 0x494   :  { %v6290_v50 = vpop.f32.mrb[9].mxu1 }
 0x497   :  { %v1195_v51 = vpop.f32.mrb[4].mxu0 }
 0x498   :  { %v1272_v14 = vcombine.low %v1049_v45, %v1195_v51  ;;  %v1273_v52 = vcombine.high %v1049_v45, %v1195_v51  ;;  %v6295_v53 = vpop.f32.mrb[5].mxu0 }
 0x49a   :  { %v1280_v34 = vrot.slane %v1272_v14, %v6989_v24  ;;  %v1287_v58 = vrot.slane %v1273_v52, %v6989_v24 }
 0x4c8   :  { %v1268_v54 = vpop.f32.mrb[10].mxu1 }
 0x4c9   :  { %v1288_v22 = vcombine.low %v1122_v49, %v1268_v54  ;;  %v1289_v55 = vcombine.high %v1122_v49, %v1268_v54  ;;  %v6300_v56 = vpop.f32.mrb[11].mxu1 }
 0x4cb   :  { %v1296_v59 = vrot.slane %v1288_v22, %v6989_v24  ;;  %v1303_v60 = vrot.slane %v1289_v55, %v6989_v24 }
 0x4cd   :  { %v1304_v61 = vcombine.low %v1280_v34, %v1296_v59  ;;  %v1305_v63 = vcombine.high %v1280_v34, %v1296_v59  ;;  %v1320_v12 = vcombine.low %v1287_v58, %v1303_v60  ;;  %v1321_v0 = vcombine.high %v1287_v58, %v1303_v60 }
 0x4cf   :  { %v1312_v3 = vrot.slane %v1304_v61, %v6992_v31  ;;  %v1319_v4 = vrot.slane %v1305_v63, %v6992_v31  ;;  %v1328_v19 = vrot.slane %v1320_v12, %v6992_v31  ;;  %v1335_v5 = vrot.slane %v1321_v0, %v6992_v31 }
 0x4d1   :  { %v1340_v6 = vcombine.low %v1312_v3, %v1319_v4  ;;  %v6027_v7 = vcombine.high %v1312_v3, %v1319_v4  ;;  %v1356_v8 = vcombine.low %v1328_v19, %v1335_v5  ;;  %v6028_v9 = vcombine.high %v1328_v19, %v1335_v5  ;;  %v1939_v11 = vpop.f32.mrb[6].mxu0  ;;  %v2015_v62 = vpop.f32.mrb[12].mxu1 }
 0x4d2   :  { %v1940_v15 = vadd.f32 %v1939_v11, %v7227_v2  ;;  %v2016_v16 = vadd.f32 %v2015_v62, %v7227_v2  ;;  %v6305_v46 = vpop.f32.mrb[7].mxu0  ;;  %v6310_v17 = vpop.f32.mrb[13].mxu1 }
 0x4d3   :  { %v1347_v18 = vrot.slane %v1340_v6, %v6989_v24  ;;  %v1355_v20 = vrot.slane %v6027_v7, %v6989_v24  ;;  %v1363_v21 = vrot.slane %v1356_v8, %v6989_v24  ;;  %v1371_v23 = vrot.slane %v6028_v9, %v6989_v24 }
 0x4d4   :  { %v2174_v25 = vsel %vm631_vm2, %v2016_v16, -inf  ;;  %v2171_v26 = vsel %vm631_vm2, %v1940_v15, -inf }
 0x4d5   :  { %2175 = vmax.xlane.f32.xlu1 %v2174_v25  ;;  %v2167_v1 = vpop.f32.mrb[14].mxu1  ;;  %2172 = vmax.xlane.f32.xlu0 %v2171_v26  ;;  %v2091_v27 = vpop.f32.mrb[8].mxu0  ;;  %v1373_v28 = vcombine.high %v1347_v18, %v1355_v20  ;;  %v1389_v29 = vcombine.high %v1363_v21, %v1371_v23  ;;  %v1372_v30 = vcombine.low %v1347_v18, %v1355_v20 }
 0x4d6   :  { %v2092_v32 = vadd.f32 %v2091_v27, %v7227_v2  ;;  %v6315_v33 = vpop.f32.mrb[9].mxu0  ;;  %v6320_v35 = vpop.f32.mrb[15].mxu1  ;;  %v1388_v36 = vcombine.low %v1363_v21, %v1371_v23  ;;  %v2168_v40 = vadd.f32 %v2167_v1, %v7227_v2 }
 0x4d7   :  { %v1387_v37 = vrot.slane %v1373_v28, %v6992_v31  ;;  %v1403_v38 = vrot.slane %v1389_v29, %v6992_v31  ;;  %v7245_v39 = vrot.slane %v1372_v30, %v6992_v31 }
 0x4d8   :  { %v2177_v41 = vsel %vm631_vm2, %v2092_v32, -inf  ;;  %v7250_v42 = vrot.slane %v1388_v36, %v6992_v31  ;;  %v2180_v49 = vsel %vm631_vm2, %v2168_v40, -inf }
 0x4d9   :  { %2178 = vmax.xlane.f32.xlu0 %v2177_v41  ;;  %v1406_v43 = vcombine.low %v1387_v37, %v1403_v38  ;;  %v1407_v44 = vcombine.high %v1387_v37, %v1403_v38 }
 0x4da   :  { %v1404_v45 = vcombine.low %v7245_v39, %v7250_v42  ;;  %v1405_v48 = vcombine.high %v7245_v39, %v7250_v42 }
 0x4dd   :  { %2181 = vmax.xlane.f32.xlu0 %v2180_v49 }
 0x4e6   :  { %1447 = vrot.lane.b32.xlu1 %v6962_v10, %s6819_s24 }
 0x562   :  { %v2176_v50 = vpop.xlane.xlu1 %2175  ;;  %v2173_v51 = vpop.xlane.xlu0 %2172 }
 0x563   :  { %v2184_v14 = vsub.f32 %v2016_v16, %v2176_v50  ;;  %v2183_v52 = vsub.f32 %v1940_v15, %v2173_v51 }
 0x565   :  { %v2189_v53 = vmul.f32 1.442695, %v2184_v14  ;;  %v2187_v54 = vmul.f32 1.442695, %v2183_v52 }
 0x566   :  { %v2179_v22 = vpop.xlane.xlu0 %2178  ;;  %v1448_v19 = vpop.permute.xlu1 %1447 }
 0x567   :  { %6633 = vpow2.f32 %v2189_v53  ;;  %v2185_v55 = vsub.f32 %v2092_v32, %v2179_v22 }
 0x568   :  { %6635 = vpow2.f32 %v2187_v54 }
 0x569   :  { %v2191_v56 = vmul.f32 1.442695, %v2185_v55 }
 0x56a   :  { %v2182_v57 = vpop.xlane.xlu0 %2181 }
 0x56b   :  { %6637 = vpow2.f32 %v2191_v56  ;;  %v2186_v34 = vsub.f32 %v2168_v40, %v2182_v57 }
 0x56d   :  { %v2193_v58 = vmul.f32 1.442695, %v2186_v34 }
 0x56f   :  { %6639 = vpow2.f32 %v2193_v58 }
 0x571   :  { %v7259_v59 = vpop.eup %6633 }
 0x572   :  { %v7261_v60 = vpop.eup %6635  ;;  %v2198_v61 = vsel %vm631_vm2, %v7259_v59, 0.0 }
 0x573   :  { %v2195_v63 = vsel %vm631_vm2, %v7261_v60, 0.0  ;;  %2199 = vadd.xlane.f32.xlu0 %v2198_v61 }
 0x574   :  { %2196 = vadd.xlane.f32.xlu1 %v2195_v63 }
 0x575   :  { %v7267_v12 = vpop.eup %6637 }
 0x576   :  { %v2201_v0 = vsel %vm631_vm2, %v7267_v12, 0.0 }
 0x578   :  { %2202 = vadd.xlane.f32.xlu1 %v2201_v0 }
 0x579   :  { %v7271_v3 = vpop.eup %6639 }
 0x57a   :  { %v2204_v4 = vsel %vm631_vm2, %v7271_v3, 0.0 }
 0x57b   :  { %2205 = vadd.xlane.f32.xlu0 %v2204_v4 }
 0x589   :  { %1453 = vrot.lane.b32.xlu1 %v6962_v10, %s6818_s23 }
 0x58d   :  { %1456 = vrot.lane.b32.xlu1 %v6962_v10, %s6820_s26 }
 0x591   :  { %1413 = vrot.lane.b32.xlu1 %v1406_v43, %s6821_s27  ;;  %1450 = vrot.lane.b32.xlu0 %v6962_v10, %s6817_s1 }
 0x595   :  { %1417 = vrot.lane.b32.xlu1 %v1407_v44, %s7915_s28  ;;  %1409 = vrot.lane.b32.xlu0 %v1405_v48, %s7913_s30 }
 0x600   :  { %v2200_v6 = vpop.xlane.xlu0 %2199 }
 0x601   :  { %v2197_v5 = vpop.xlane.xlu1 %2196  ;;  %6641 = vrcp.f32 %v2200_v6 }
 0x602   :  { %6643 = vrcp.f32 %v2197_v5 }
 0x605   :  { %v2203_v7 = vpop.xlane.xlu1 %2202 }
 0x606   :  { %6645 = vrcp.f32 %v2203_v7 }
 0x608   :  { %v2206_v8 = vpop.xlane.xlu0 %2205 }
 0x609   :  { %v1454_v9 = vpop.permute.xlu1 %1453  ;;  %6647 = vrcp.f32 %v2206_v8 }
 0x60a   :  { %v1595_v11 = vcombine.low %v1448_v19, %v1454_v9  ;;  %v1596_v62 = vcombine.high %v1448_v19, %v1454_v9 }
 0x60b   :  { %v6642_v48 = vpop.eup %6641 }
 0x60c   :  { %v1451_v15 = vpop.permute.xlu0 %1450  ;;  %v1603_v18 = vrot.slane %v1595_v11, %v6989_v24  ;;  %v1610_v10 = vrot.slane %v1596_v62, %v6989_v24  ;;  %v6644_v14 = vpop.eup %6643  ;;  %v2212_v61 = vmul.f32 %v6642_v48, %v7259_v59 }
 0x60d   :  { %v1457_v16 = vpop.permute.xlu1 %1456  ;;  %v2211_v58 = vmul.f32 %v6644_v14, %v7261_v60 }
 0x60e   :  { %v1611_v46 = vcombine.low %v1451_v15, %v1457_v16  ;;  %v1612_v17 = vcombine.high %v1451_v15, %v1457_v16 }
 0x610   :  { %v1619_v20 = vrot.slane %v1611_v46, %v6989_v24  ;;  %v1626_v21 = vrot.slane %v1612_v17, %v6989_v24  ;;  %v1410_v55 = vpop.permute.xlu0 %1409  ;;  %v6646_v34 = vpop.eup %6645 }
 0x611   :  { %v1414_v52 = vpop.permute.xlu1 %1413  ;;  %v1420_v0 = vsel %vm631_vm2, %v1404_v45, %v1410_v55  ;;  %v2213_v59 = vmul.f32 %v6646_v34, %v7267_v12  ;;  %v2658_v45 = vld [vmem:[%s7901_s4] sm:$0xff]  ;;  %v2659_v12 = vld [vmem:[%s7901_s4 + $0x8] sm:$0xff] }
 0x612   :  { %v1627_v23 = vcombine.low %v1603_v18, %v1619_v20  ;;  %v1628_v25 = vcombine.high %v1603_v18, %v1619_v20  ;;  %v1643_v26 = vcombine.low %v1610_v10, %v1626_v21  ;;  %v1644_v1 = vcombine.high %v1610_v10, %v1626_v21 }
 0x613   :  { %v6648_v63 = vpop.eup %6647  ;;  %v1422_v39 = vsel %vm1421_vm3, %v1420_v0, %v1414_v52 }
 0x614   :  { %v1635_v27 = vrot.slane %v1627_v23, %v6992_v31  ;;  %v1642_v28 = vrot.slane %v1628_v25, %v6992_v31  ;;  %v1651_v29 = vrot.slane %v1643_v26, %v6992_v31  ;;  %v1658_v30 = vrot.slane %v1644_v1, %v6992_v31 }
 0x615   :  { %v1418_v5 = vpop.permute.xlu1 %1417  ;;  %v2214_v60 = vmul.f32 %v6648_v63, %v7271_v3  ;;  %v6522_v3 = vpack.c.bf16 %v2659_v12, %v2658_v45 }
 0x616   :  { %v1799_v32 = vcombine.low %v1635_v27, %v1642_v28  ;;  %v6037_v33 = vcombine.high %v1635_v27, %v1642_v28  ;;  %v1815_v35 = vcombine.low %v1651_v29, %v1658_v30  ;;  %v6038_v36 = vcombine.high %v1651_v29, %v1658_v30  ;;  %v2660_v29 = vld [vmem:[%s7901_s4 + $0x10] sm:$0xff]  ;;  %v2661_v30 = vld [vmem:[%s7901_s4 + $0x18] sm:$0xff] }
 0x617   :  { %v1424_v42 = vsel %vm1423_vm4, %v1422_v39, %v1418_v5 }
 0x618   :  { %v1806_v37 = vrot.slane %v1799_v32, %v6989_v24  ;;  %v1814_v38 = vrot.slane %v6037_v33, %v6989_v24  ;;  %v1822_v40 = vrot.slane %v1815_v35, %v6989_v24  ;;  %v1830_v41 = vrot.slane %v6038_v36, %v6989_v24 }
 0x61a   :  { %v1831_v43 = vcombine.low %v1806_v37, %v1814_v38  ;;  %v1832_v44 = vcombine.high %v1806_v37, %v1814_v38  ;;  %v1847_v49 = vcombine.low %v1822_v40, %v1830_v41  ;;  %v1848_v50 = vcombine.high %v1822_v40, %v1830_v41 }
 0x61b   :  { %v6526_v37 = vpack.c.bf16 %v2661_v30, %v2660_v29 }
 0x61c   :  { %v1839_v51 = vrot.slane %v1831_v43, %v6992_v31  ;;  %v1855_v53 = vrot.slane %v1847_v49, %v6992_v31  ;;  %v1846_v54 = vrot.slane %v1832_v44, %v6992_v31  ;;  %v1862_v22 = vrot.slane %v1848_v50, %v6992_v31 }
 0x61e   :  { %v1863_v56 = vcombine.low %v1839_v51, %v1855_v53  ;;  %v1864_v57 = vcombine.high %v1839_v51, %v1855_v53  ;;  %v1865_v4 = vcombine.low %v1846_v54, %v1862_v22  ;;  %v1866_v19 = vcombine.high %v1846_v54, %v1862_v22 }
 0x620   :  { %6322 = vmatpush3.msra.mxu0 %v1863_v56  ;;  %6327 = vmatpush3.msra.mxu1 %v1864_v57 }
 0x621   :  { %6324 = vmatmul.mubr.msk.f32.vlgmr.msra.gmra.mrb[10].mxu0 %vm631_vm2, %v2211_v58  ;;  %6329 = vmatmul.mubr.msk.f32.vlgmr.msra.gmra.mrb[16].mxu1 %vm631_vm2, %v2212_v61 }
 0x622   :  { %6331 = vmatprep.subr.mxu0 %v6812_v13  ;;  %6336 = vmatprep.subr.mxu1 %v6812_v13 }
 0x623   :  { %6332 = vmatpush3.msra.mxu0 %v1865_v4  ;;  %6337 = vmatpush3.msra.mxu1 %v1866_v19 }
 0x624   :  { %6333 = vmatprep.mubr.msk.f32.mxu0 %vm6814_vm1, %v6812_v13  ;;  %6338 = vmatprep.mubr.msk.f32.mxu1 %vm6814_vm1, %v6812_v13 }
 0x625   :  { %6334 = vmatmul.mubr.msk.f32.vlgmr.msra.gmra.mrb[12].mxu0 %vm631_vm2, %v2213_v59  ;;  %6339 = vmatmul.mubr.msk.f32.vlgmr.msra.gmra.mrb[18].mxu1 %vm631_vm2, %v2214_v60  ;;  %v6053_v60 = vld [vmem:[%s7902_s5] ss:$0 sm:$0xff] }
 0x626   :  { %6349 = vmatprep.mubr.msk.f32.mxu0 %vm107_vm0, %v1424_v42  ;;  %6523 = vmatprep.subr.bf16.mxu0 %v6522_v3 }
 0x627   :  { %6525 = vmatpush3.bf16.msra.mxu0 %v6522_v3  ;;  %v6705_v3 = vld [vmem:[#allocation2 + $0x8] sm:$0xff] }
 0x628   :  { %6527 = vmatprep.subr.bf16.mxu0 %v6526_v37 }
 0x62b   :  { %6529 = vmatpush3.bf16.msra.mxu0 %v6526_v37 }
 0x6f4   :  { %v2284_v6 = vpop.f32.mrb[10].mxu0  ;;  %v2357_v7 = vpop.f32.mrb[16].mxu1 }
 0x6f5   :  { %v6325_v8 = vpop.f32.mrb[11].mxu0  ;;  %v6330_v9 = vpop.f32.mrb[17].mxu1 }
 0x6f8   :  { %v2430_v11 = vpop.f32.mrb[12].mxu0  ;;  %v2503_v62 = vpop.f32.mrb[18].mxu1 }
 0x6f9   :  { %v2507_v15 = vcombine.low %v2284_v6, %v2430_v11  ;;  %v2508_v16 = vcombine.high %v2284_v6, %v2430_v11  ;;  %v2523_v46 = vcombine.low %v2357_v7, %v2503_v62  ;;  %v2524_v17 = vcombine.high %v2357_v7, %v2503_v62  ;;  %v6335_v18 = vpop.f32.mrb[13].mxu0  ;;  %v6340_v10 = vpop.f32.mrb[19].mxu1  ;;  %v6706_v7 = vld [vmem:[#allocation2] sm:$0xff] }
 0x6fb   :  { %v2515_v20 = vrot.slane %v2507_v15, %v6989_v24  ;;  %v2522_v21 = vrot.slane %v2508_v16, %v6989_v24  ;;  %v2531_v23 = vrot.slane %v2523_v46, %v6989_v24  ;;  %v2538_v25 = vrot.slane %v2524_v17, %v6989_v24 }
 0x6fd   :  { %v2539_v26 = vcombine.low %v2515_v20, %v2531_v23  ;;  %v2540_v1 = vcombine.high %v2515_v20, %v2531_v23  ;;  %v2555_v27 = vcombine.low %v2522_v21, %v2538_v25  ;;  %v2556_v28 = vcombine.high %v2522_v21, %v2538_v25  ;;  %v2797_v25 = vld [vmem:[%s7905_s8] sm:$0xff] }
 0x6ff   :  { %v2547_v32 = vrot.slane %v2539_v26, %v6992_v31  ;;  %v2554_v33 = vrot.slane %v2540_v1, %v6992_v31  ;;  %v2563_v35 = vrot.slane %v2555_v27, %v6992_v31  ;;  %v2570_v36 = vrot.slane %v2556_v28, %v6992_v31  ;;  %v2798_v26 = vld [vmem:[%s7905_s8 + $0x8] sm:$0xff]  ;;  %v2799_v27 = vld [vmem:[%s7905_s8 + $0x10] sm:$0xff]  ;;  %v2800_v28 = vld [vmem:[%s7905_s8 + $0x18] sm:$0xff] }
 0x700   :  { %v6530_v1 = vpack.c.bf16 %v2798_v26, %v2797_v25  ;;  %v6534_v29 = vpack.c.bf16 %v2800_v28, %v2799_v27 }
 0x701   :  { %v2575_v38 = vcombine.low %v2547_v32, %v2554_v33  ;;  %v6051_v40 = vcombine.high %v2547_v32, %v2554_v33  ;;  %v2591_v41 = vcombine.low %v2563_v35, %v2570_v36  ;;  %v6052_v43 = vcombine.high %v2563_v35, %v2570_v36 }
 0x702   :  { %6531 = vmatprep.subr.bf16.mxu1 %v6530_v1 }
 0x703   :  { %v2582_v44 = vrot.slane %v2575_v38, %v6989_v24  ;;  %v2590_v48 = vrot.slane %v6051_v40, %v6989_v24  ;;  %v2598_v49 = vrot.slane %v2591_v41, %v6989_v24  ;;  %v2606_v50 = vrot.slane %v6052_v43, %v6989_v24  ;;  %6533 = vmatpush3.bf16.msra.mxu1 %v6530_v1  ;;  %v6056_v40 = vld [vmem:[%s7903_s6] ss:$0 sm:$0xff]  ;;  %v6057_v43 = vld [vmem:[#allocation5] ss:$0 sm:$0xff] }
 0x704   :  { %6535 = vmatprep.subr.bf16.mxu1 %v6534_v29 }
 0x705   :  { %v2608_v51 = vcombine.high %v2582_v44, %v2590_v48  ;;  %v2624_v14 = vcombine.high %v2598_v49, %v2606_v50  ;;  %v2607_v52 = vcombine.low %v2582_v44, %v2590_v48  ;;  %v2623_v53 = vcombine.low %v2598_v49, %v2606_v50 }
 0x707   :  { %v2622_v54 = vrot.slane %v2608_v51, %v6992_v31  ;;  %v2638_v22 = vrot.slane %v2624_v14, %v6992_v31  ;;  %v2615_v55 = vrot.slane %v2607_v52, %v6992_v31  ;;  %v2631_v56 = vrot.slane %v2623_v53, %v6992_v31  ;;  %6537 = vmatpush3.bf16.msra.mxu1 %v6534_v29  ;;  %v2899_v52 = vld [vmem:[%s7907_s10] sm:$0xff]  ;;  %v2900_v53 = vld [vmem:[%s7907_s10 + $0x8] sm:$0xff] }
 0x709   :  { %v2642_v57 = vcombine.high %v2622_v54, %v2638_v22  ;;  %v2640_v34 = vcombine.high %v2615_v55, %v2631_v56  ;;  %v2639_v58 = vcombine.low %v2615_v55, %v2631_v56  ;;  %v2641_v61 = vcombine.low %v2622_v54, %v2638_v22  ;;  %v2901_v22 = vld [vmem:[%s7907_s10 + $0x10] sm:$0xff]  ;;  %v2902_v55 = vld [vmem:[%s7907_s10 + $0x18] sm:$0xff] }
 0x70a   :  { %v6538_v54 = vpack.c.bf16 %v2900_v53, %v2899_v52  ;;  %v6542_v56 = vpack.c.bf16 %v2902_v55, %v2901_v22  ;;  %v6064_v52 = vld [vmem:[%s7909_s12] ss:$0 sm:$0xff] }
 0x70b   :  { %2652 = vrot.lane.b32.xlu1 %v2642_v57, %s7915_s28  ;;  %2644 = vrot.lane.b32.xlu0 %v2640_v34, %s7913_s30  ;;  %v2903_v57 = vld [vmem:[%s7907_s10 + $0x20] sm:$0xff]  ;;  %v2904_v34 = vld [vmem:[%s7907_s10 + $0x28] sm:$0xff]  ;;  %s6823_s30 = smov [#allocation8]  }
 0x70c   :  { %6539 = vmatprep.subr.bf16.mxu0 %v6538_v54  ;;  %v6065_v55 = vld [vmem:[%s7910_s13] ss:$0 sm:$0xff]  ;;  %s5989_s28 = sshll.u32 %s6823_s30, 4  ;;  %s5990_s28 = int_to_ptr.vmem [resolvable:$true] %s5989_s28 }
 0x70d   :  { %s6773_s29 = scalar_lea.vmem %s5990_s28, 256  ;;  %p6778_p11 = scmp.lt.s32.totalorder %s5990_s28, %s5990_s28 }
 0x70e   :  { %p6774_p10 = scmp.ne.s32.totalorder %s5990_s28, %s6773_s29  ;;  %p6779_p12 = scmp.lt.s32.totalorder %s6773_s29, %s6773_s29 }
 0x70f   :  { %2648 = vrot.lane.b32.xlu0 %v2641_v61, %s6821_s27  ;;  %v2905_v61 = vld [vmem:[%s7907_s10 + $0x30] sm:$0xff] }
 0x710   :  { %p6780_p13 = por %p6779_p12, %p6778_p11 }
 0x712   :  { %p6781_p0 = pnand %p6780_p13, %p6774_p10 }
 0x77d   :  { %v2645_v63 = vpop.permute.xlu0 %2644  ;;  %v2653_v19 = vpop.permute.xlu1 %2652 }
 0x77e   :  { %v2655_v0 = vsel %vm631_vm2, %v2639_v58, %v2645_v63  ;;  %v6546_v58 = vpack.c.bf16 %v2904_v34, %v2903_v57  ;;  %v2906_v63 = vld [vmem:[%s7907_s10 + $0x38] sm:$0xff] }
 0x781   :  { %v2649_v4 = vpop.permute.xlu0 %2648 }
 0x782   :  { %v2656_v5 = vsel %vm1421_vm3, %v2655_v0, %v2649_v4  ;;  %v6550_v0 = vpack.c.bf16 %v2906_v63, %v2905_v61  ;;  %v6058_v4 = vld [vmem:[#allocation7] ss:$0 sm:$0xff]  ;;  %v6066_v61 = vld [vmem:[%s7900_s3] ss:$0 sm:$0xff]  ;;  %s7917_s3 = smov 24  }
 0x783   :  { %v2657_v59 = vsel %vm1423_vm4, %v2656_v5, %v2653_v19 }
 0x784   :  { %6350 = vmatmul.mubr.msk.f32.vlgmr.msra.gmra.mrb[14].mxu0 %vm107_vm0, %v2657_v59 }
 0x785   :  { %6541 = vmatpush3.bf16.msra.mxu0 %v6538_v54 }
 0x786   :  { %6543 = vmatprep.subr.bf16.mxu0 %v6542_v56 }
 0x789   :  { %6545 = vmatpush3.bf16.msra.mxu0 %v6542_v56 }
 0x78a   :  { %6547 = vmatprep.subr.bf16.mxu0 %v6546_v58 }
 0x78d   :  { %6549 = vmatpush3.bf16.msra.mxu0 %v6546_v58 }
 0x78e   :  { %6551 = vmatprep.subr.bf16.mxu0 %v6550_v0 }
 0x791   :  { %6553 = vmatpush3.bf16.msra.mxu0 %v6550_v0 }
 0x792   :  { %6403 = vmatprep.subr.mxu0 %v6812_v13 }
 0x857   :  { %v6351_v39 = vpop.f32.mrb[14].mxu0 }
 0x858   :  { %v2747_v42 = vadd.f32 %v6351_v39, %v6053_v60  ;;  %v2741_v45 = vpop.f32.mrb[15].mxu0 }
 0x859   :  { %v2742_v12 = vadd.f32 %v6053_v60, %v2741_v45 }
 0x85a   :  { %v2751_v6 = vadd.f32 %v6705_v3, %v2747_v42 }
 0x85b   :  { %v2750_v8 = vadd.f32 %v6706_v7, %v2742_v12 }
 0x85c   :  { %v2757_v9 = vsel %vm107_vm0, %v2751_v6, 0.0 }
 0x85d   :  { %2758 = vadd.xlane.f32.xlu1 %v2757_v9  ;;  %v2754_v11 = vsel %vm107_vm0, %v2750_v8, 0.0 }
 0x85e   :  { %2755 = vadd.xlane.f32.xlu0 %v2754_v11 }
 0x8ea   :  { %v2759_v62 = vpop.xlane.xlu1 %2758 }
 0x8eb   :  { %v2762_v15 = vmul.f32 0.03125, %v2759_v62  ;;  %v2756_v16 = vpop.xlane.xlu0 %2755  ;;  %v6061_v62 = vld [vmem:[%s7908_s11] ss:$0 sm:$0xff] }
 0x8ec   :  { %v2761_v46 = vmul.f32 0.03125, %v2756_v16 }
 0x8ed   :  { %v2764_v17 = vsub.f32 %v2751_v6, %v2762_v15 }
 0x8ee   :  { %v2763_v18 = vsub.f32 %v2750_v8, %v2761_v46 }
 0x8ef   :  { %v2766_v21 = vmul.f32 %v2764_v17, %v2764_v17 }
 0x8f0   :  { %v2765_v10 = vmul.f32 %v2763_v18, %v2763_v18 }
 0x8f1   :  { %v2770_v23 = vsel %vm107_vm0, %v2766_v21, 0.0 }
 0x8f2   :  { %v2767_v20 = vsel %vm107_vm0, %v2765_v10, 0.0 }
 0x8f3   :  { %2768 = vadd.xlane.f32.xlu0 %v2767_v20 }
 0x8f7   :  { %2771 = vadd.xlane.f32.xlu0 %v2770_v23 }
 0x980   :  { %v2769_v30 = vpop.xlane.xlu0 %2768 }
 0x981   :  { %v2773_v32 = vmul.f32 0.03125, %v2769_v30 }
 0x983   :  { %v2775_v33 = vadd.f32 1e-05, %v2773_v32 }
 0x984   :  { %v2772_v35 = vpop.xlane.xlu0 %2771 }
 0x985   :  { %6649 = vrsqrt.f32 %v2775_v33  ;;  %v2774_v36 = vmul.f32 0.03125, %v2772_v35  ;;  %v3042_v35 = vld [vmem:[%s7899_s2] sm:$0xff] }
 0x987   :  { %v2776_v37 = vadd.f32 1e-05, %v2774_v36  ;;  %v3043_v36 = vld [vmem:[%s7899_s2 + $0x8] sm:$0xff] }
 0x989   :  { %6651 = vrsqrt.f32 %v2776_v37  ;;  %v6554_v37 = vpack.c.bf16 %v3043_v36, %v3042_v35 }
 0x98b   :  { %6555 = vmatprep.subr.bf16.mxu1 %v6554_v37 }
 0x98f   :  { %v6650_v38 = vpop.eup %6649 }
 0x990   :  { %v2779_v41 = vmul.f32 %v6650_v38, %v2763_v18  ;;  %v3044_v38 = vld [vmem:[%s7899_s2 + $0x10] sm:$0xff] }
 0x992   :  { %v2787_v44 = vmul.f32 %v6056_v40, %v2779_v41 }
 0x993   :  { %v6652_v48 = vpop.eup %6651 }
 0x994   :  { %v2780_v49 = vmul.f32 %v6652_v48, %v2764_v17  ;;  %v2795_v50 = vadd.f32 %v6057_v43, %v2787_v44 }
 0x996   :  { %v2788_v51 = vmul.f32 %v6056_v40, %v2780_v49  ;;  %6360 = vmatprep.mubr.msk.f32.mxu1 %vm107_vm0, %v2795_v50  ;;  %v3045_v40 = vld [vmem:[%s7899_s2 + $0x18] sm:$0xff] }
 0x997   :  { %v6558_v41 = vpack.c.bf16 %v3045_v40, %v3044_v38 }
 0x998   :  { %v2796_v14 = vadd.f32 %v6057_v43, %v2788_v51 }
 0x99a   :  { %6361 = vmatmul.mubr.msk.f32.vlgmr.msra.gmra.mrb[20].mxu1 %vm107_vm0, %v2796_v14 }
 0x99b   :  { %6557 = vmatpush3.bf16.msra.mxu1 %v6554_v37 }
 0x99c   :  { %6559 = vmatprep.subr.bf16.mxu1 %v6558_v41 }
 0x99f   :  { %6561 = vmatpush3.bf16.msra.mxu1 %v6558_v41 }
 0x9a0   :  { %6393 = vmatprep.subr.mxu1 %v6812_v13 }
 0xa6d   :  { %v6362_v19 = vpop.f32.mrb[20].mxu1 }
 0xa6e   :  { %v2886_v5 = vadd.f32 %v6362_v19, %v6058_v4  ;;  %v2880_v59 = vpop.f32.mrb[21].mxu1 }
 0xa6f   :  { %v2881_v60 = vadd.f32 %v6058_v4, %v2880_v59 }
 0xa70   :  { %v2892_v39 = vmul.f32 0.70710677, %v2886_v5  ;;  %v2890_v8 = vmul.f32 0.5, %v2886_v5 }
 0xa71   :  { %v2891_v42 = vmul.f32 0.70710677, %v2881_v60  ;;  %v2889_v6 = vmul.f32 0.5, %v2881_v60 }
 0xa72   :  { %6653 = verf.f32 %v2892_v39 }
 0xa73   :  { %6655 = verf.f32 %v2891_v42 }
 0xa7c   :  { %v6654_v45 = vpop.eup %6653 }
 0xa7d   :  { %v6656_v12 = vpop.eup %6655  ;;  %v2896_v3 = vadd.f32 1.0, %v6654_v45 }
 0xa7e   :  { %v2895_v7 = vadd.f32 1.0, %v6656_v12 }
 0xa7f   :  { %v2898_v11 = vmul.f32 %v2896_v3, %v2890_v8 }
 0xa80   :  { %v2897_v9 = vmul.f32 %v2895_v7, %v2889_v6 }
 0xa82   :  { %6379 = vmatprep.mubr.msk.f32.mxu0 %vm2914_vm5, %v2897_v9 }
 0xa83   :  { %6380 = vmatmul.mubr.msk.f32.vlgmr.msra.gmra.mrb[16].mxu0 %vm2914_vm5, %v2898_v11 }
 0xa84   :  { %6405 = vmatprep.mubr.msk.f32.mxu0 %vm6814_vm1, %v6812_v13 }
 0xb56   :  { %v6381_v15 = vpop.f32.mrb[16].mxu0 }
 0xb57   :  { %v2993_v16 = vadd.f32 %v6381_v15, %v6061_v62  ;;  %v2987_v46 = vpop.f32.mrb[17].mxu0 }
 0xb58   :  { %v2988_v17 = vadd.f32 %v6061_v62, %v2987_v46 }
 0xb59   :  { %v2997_v18 = vadd.f32 %v2993_v16, %v2796_v14 }
 0xb5a   :  { %v2996_v10 = vadd.f32 %v2988_v17, %v2795_v50 }
 0xb5b   :  { %v3003_v20 = vsel %vm107_vm0, %v2997_v18, 0.0 }
 0xb5c   :  { %3004 = vadd.xlane.f32.xlu0 %v3003_v20  ;;  %v3000_v21 = vsel %vm107_vm0, %v2996_v10, 0.0 }
 0xb5d   :  { %3001 = vadd.xlane.f32.xlu1 %v3000_v21 }
 0xbe9   :  { %v3005_v23 = vpop.xlane.xlu0 %3004 }
 0xbea   :  { %v3007_v25 = vmul.f32 0.03125, %v3005_v23  ;;  %v3002_v26 = vpop.xlane.xlu1 %3001 }
 0xbeb   :  { %v3006_v1 = vmul.f32 0.03125, %v3002_v26 }
 0xbec   :  { %v3009_v27 = vsub.f32 %v2997_v18, %v3007_v25 }
 0xbed   :  { %v3008_v28 = vsub.f32 %v2996_v10, %v3006_v1 }
 0xbee   :  { %v3011_v29 = vmul.f32 %v3009_v27, %v3009_v27 }
 0xbef   :  { %v3010_v30 = vmul.f32 %v3008_v28, %v3008_v28 }
 0xbf0   :  { %v3015_v32 = vsel %vm107_vm0, %v3011_v29, 0.0 }
 0xbf1   :  { %3016 = vadd.xlane.f32.xlu0 %v3015_v32  ;;  %v3012_v33 = vsel %vm107_vm0, %v3010_v30, 0.0 }
 0xbf2   :  { %3013 = vadd.xlane.f32.xlu1 %v3012_v33 }
 0xc7e   :  { %v3017_v43 = vpop.xlane.xlu0 %3016 }
 0xc7f   :  { %v3019_v44 = vmul.f32 0.03125, %v3017_v43  ;;  %v3014_v48 = vpop.xlane.xlu1 %3013 }
 0xc80   :  { %v3018_v49 = vmul.f32 0.03125, %v3014_v48 }
 0xc81   :  { %v3021_v50 = vadd.f32 1e-05, %v3019_v44 }
 0xc82   :  { %v3020_v51 = vadd.f32 1e-05, %v3018_v49 }
 0xc83   :  { %6657 = vrsqrt.f32 %v3021_v50 }
 0xc84   :  { %6659 = vrsqrt.f32 %v3020_v51 }
 0xc8d   :  { %v6658_v14 = vpop.eup %6657 }
 0xc8e   :  { %v6660_v53 = vpop.eup %6659  ;;  %v3025_v54 = vmul.f32 %v6658_v14, %v3009_v27 }
 0xc8f   :  { %v3024_v22 = vmul.f32 %v6660_v53, %v3008_v28 }
 0xc90   :  { %v3033_v56 = vmul.f32 %v6064_v52, %v3025_v54 }
 0xc91   :  { %v3032_v57 = vmul.f32 %v6064_v52, %v3024_v22 }
 0xc92   :  { %v7437_v58 = vadd.f32 %v6065_v55, %v3033_v56 }
 0xc93   :  { %v7435_v34 = vadd.f32 %v6065_v55, %v3032_v57 }
 0xc95   :  { %6390 = vmatprep.mubr.msk.f32.mxu1 %vm107_vm0, %v7435_v34 }
 0xc96   :  { %6391 = vmatmul.mubr.msk.f32.vlgmr.msra.gmra.mrb[22].mxu1 %vm107_vm0, %v7437_v58 }
 0xc97   :  { %6395 = vmatprep.mubr.msk.f32.mxu1 %vm6814_vm1, %v6812_v13 }
 0xd69   :  { %v6392_v63 = vpop.f32.mrb[22].mxu1 }
 0xd6a   :  { %v7448_v0 = vadd.f32 %v6392_v63, %v6066_v61  ;;  %v3125_v4 = vpop.f32.mrb[23].mxu1 }
 0xd6b   :  { %v7450_v19 = vadd.f32 %v6066_v61, %v3125_v4 }
 0xd6d   :  { %3147 = vrot.lane.b32.xlu0 %v7450_v19, %s6809_s19  ;;  %3144 = vrot.lane.b32.xlu1 %v7450_v19, %s6807_s17 }
 0xd71   :  { %3135 = vrot.lane.b32.xlu0 %v7450_v19, %s6811_s16  ;;  %3150 = vrot.lane.b32.xlu1 %v7450_v19, %s6806_s15 }
 0xd75   :  { %3141 = vrot.lane.b32.xlu0 %v7450_v19, %s6813_s20  ;;  %3153 = vrot.lane.b32.xlu1 %v7450_v19, %s6808_s18 }
 0xd79   :  { %3138 = vrot.lane.b32.xlu1 %v7450_v19, %s6810_s0 }
 0xddf   :  { %v3148_v5 = vpop.permute.xlu0 %3147  ;;  %v3145_v59 = vpop.permute.xlu1 %3144 }
 0xde3   :  { %v3136_v60 = vpop.permute.xlu0 %3135  ;;  %v3151_v39 = vpop.permute.xlu1 %3150 }
 0xde4   :  { %v3200_v42 = vcombine.low %v3145_v59, %v3151_v39  ;;  %v3201_v45 = vcombine.high %v3145_v59, %v3151_v39 }
 0xde6   :  { %v3208_v8 = vrot.slane %v3200_v42, %v6989_v24  ;;  %v3215_v9 = vrot.slane %v3201_v45, %v6989_v24 }
 0xde7   :  { %v3154_v12 = vpop.permute.xlu1 %3153  ;;  %v3142_v3 = vpop.permute.xlu0 %3141 }
 0xde8   :  { %v3216_v6 = vcombine.low %v3148_v5, %v3154_v12  ;;  %v3217_v7 = vcombine.high %v3148_v5, %v3154_v12  ;;  %v3184_v15 = vcombine.low %v3136_v60, %v3142_v3  ;;  %v3185_v16 = vcombine.high %v3136_v60, %v3142_v3 }
 0xdea   :  { %v3224_v11 = vrot.slane %v3216_v6, %v6989_v24  ;;  %v3231_v62 = vrot.slane %v3217_v7, %v6989_v24  ;;  %v3192_v28 = vrot.slane %v3184_v15, %v6989_v24  ;;  %v3199_v29 = vrot.slane %v3185_v16, %v6989_v24 }
 0xdeb   :  { %v3139_v46 = vpop.permute.xlu1 %3138 }
 0xdec   :  { %v3264_v17 = vcombine.low %v3208_v8, %v3224_v11  ;;  %v3265_v18 = vcombine.high %v3208_v8, %v3224_v11  ;;  %v3280_v10 = vcombine.low %v3215_v9, %v3231_v62  ;;  %v3281_v20 = vcombine.high %v3215_v9, %v3231_v62 }
 0xded   :  { %v3168_v21 = vcombine.low %v7450_v19, %v3139_v46  ;;  %v3169_v23 = vcombine.high %v7450_v19, %v3139_v46 }
 0xdee   :  { %v3272_v25 = vrot.slane %v3264_v17, %v6992_v31  ;;  %v3279_v26 = vrot.slane %v3265_v18, %v6992_v31  ;;  %v3288_v1 = vrot.slane %v3280_v10, %v6992_v31  ;;  %v3295_v27 = vrot.slane %v3281_v20, %v6992_v31 }
 0xdef   :  { %v3176_v30 = vrot.slane %v3168_v21, %v6989_v24  ;;  %v3183_v32 = vrot.slane %v3169_v23, %v6989_v24 }
 0xdf0   :  { %v6070_v33 = vcombine.low %v3272_v25, %v3279_v26  ;;  %v6072_v35 = vcombine.high %v3272_v25, %v3279_v26  ;;  %v6074_v36 = vcombine.low %v3288_v1, %v3295_v27  ;;  %v6076_v37 = vcombine.high %v3288_v1, %v3295_v27 }
 0xdf1   :  { %v3232_v38 = vcombine.low %v3176_v30, %v3192_v28  ;;  %v3233_v40 = vcombine.high %v3176_v30, %v3192_v28  ;;  %v3248_v41 = vcombine.low %v3183_v32, %v3199_v29  ;;  %v3249_v43 = vcombine.high %v3183_v32, %v3199_v29 }
 0xdf2   :  { %v3387_v44 = vrot.slane %v6070_v33, %v6989_v24  ;;  %v3403_v48 = vrot.slane %v6072_v35, %v6989_v24  ;;  %v3419_v49 = vrot.slane %v6074_v36, %v6989_v24  ;;  %v3435_v50 = vrot.slane %v6076_v37, %v6989_v24 }
 0xdf3   :  { %v3240_v51 = vrot.slane %v3232_v38, %v6992_v31  ;;  %v3247_v14 = vrot.slane %v3233_v40, %v6992_v31  ;;  %v3256_v52 = vrot.slane %v3248_v41, %v6992_v31  ;;  %v3263_v53 = vrot.slane %v3249_v43, %v6992_v31 }
 0xdf4   :  { %v3452_v54 = vcombine.low %v3387_v44, %v3403_v48  ;;  %v3453_v22 = vcombine.high %v3387_v44, %v3403_v48  ;;  %v3484_v55 = vcombine.low %v3419_v49, %v3435_v50  ;;  %v3485_v56 = vcombine.high %v3419_v49, %v3435_v50 }
 0xdf5   :  { %v6069_v57 = vcombine.low %v3240_v51, %v3247_v14  ;;  %v6071_v61 = vcombine.high %v3240_v51, %v3247_v14  ;;  %v6073_v63 = vcombine.low %v3256_v52, %v3263_v53  ;;  %v6075_v4 = vcombine.high %v3256_v52, %v3263_v53 }
 0xdf6   :  { %v3460_v5 = vrot.slane %v3452_v54, %v6992_v31  ;;  %v3492_v59 = vrot.slane %v3484_v55, %v6992_v31  ;;  %v3467_v60 = vrot.slane %v3453_v22, %v6992_v31  ;;  %v3499_v39 = vrot.slane %v3485_v56, %v6992_v31 }
 0xdf7   :  { %v3380_v42 = vrot.slane %v6069_v57, %v6989_v24  ;;  %v3396_v45 = vrot.slane %v6071_v61, %v6989_v24  ;;  %v3412_v12 = vrot.slane %v6073_v63, %v6989_v24  ;;  %v3428_v3 = vrot.slane %v6075_v4, %v6989_v24 }
 0xdf8   :  { %v3504_v6 = vcombine.low %v3460_v5, %v3492_v59  ;;  %v3506_v7 = vcombine.low %v3467_v60, %v3499_v39  ;;  %v3505_v20 = vcombine.high %v3460_v5, %v3492_v59  ;;  %v3507_v23 = vcombine.high %v3467_v60, %v3499_v39 }
 0xdf9   :  { %v3436_v8 = vcombine.low %v3380_v42, %v3396_v45  ;;  %v3437_v9 = vcombine.high %v3380_v42, %v3396_v45  ;;  %v3468_v11 = vcombine.low %v3412_v12, %v3428_v3  ;;  %v3469_v62 = vcombine.high %v3412_v12, %v3428_v3 }
 0xdfa   :  { %6394 = vmatpush3.xpose.msk.msra.mxu1 %vm631_vm2, %v3504_v6  ;;  %6404 = vmatpush3.xpose.msk.msra.mxu0 %vm631_vm2, %v3506_v7 }
 0xdfb   :  { %6398 = vmatprep.subr.mxu1 %v6812_v13  ;;  %v3444_v15 = vrot.slane %v3436_v8, %v6992_v31  ;;  %v3476_v16 = vrot.slane %v3468_v11, %v6992_v31  ;;  %v3451_v46 = vrot.slane %v3437_v9, %v6992_v31  ;;  %v3483_v17 = vrot.slane %v3469_v62, %v6992_v31 }
 0xdfc   :  { %6413 = vmatprep.subr.mxu0 %v6812_v13 }
 0xdfd   :  { %v3500_v18 = vcombine.low %v3444_v15, %v3476_v16  ;;  %v3502_v10 = vcombine.low %v3451_v46, %v3483_v17  ;;  %v3501_v21 = vcombine.high %v3444_v15, %v3476_v16  ;;  %v3503_v25 = vcombine.high %v3451_v46, %v3483_v17 }
 0xdff   :  { %6396 = vmatmul.mubr.msk.f32.vlgmr.msra.gmra.mrb[24].mxu1 %vm631_vm2, %v3500_v18  ;;  %6406 = vmatmul.mubr.msk.f32.vlgmr.msra.gmra.mrb[18].mxu0 %vm631_vm2, %v3502_v10 }
 0xe00   :  { %6399 = vmatpush3.xpose.msk.msra.mxu1 %vm631_vm2, %v3505_v20  ;;  %6400 = vmatprep.mubr.msk.f32.mxu1 %vm6814_vm1, %v6812_v13 }
 0xe01   :  { %6408 = vmatprep.subr.mxu1 %v6812_v13  ;;  %6415 = vmatprep.mubr.msk.f32.mxu0 %vm6814_vm1, %v6812_v13 }
 0xe03   :  { %6401 = vmatmul.mubr.msk.f32.vlgmr.msra.gmra.mrb[26].mxu1 %vm631_vm2, %v3501_v21 }
 0xe04   :  { %6409 = vmatpush3.xpose.msk.msra.mxu1 %vm631_vm2, %v3507_v23  ;;  %6410 = vmatprep.mubr.msk.f32.mxu1 %vm6814_vm1, %v6812_v13 }
 0xe05   :  { %6418 = vmatprep.subr.mxu1 %v6812_v13 }
 0xe07   :  { %6411 = vmatmul.mubr.msk.f32.vlgmr.msra.gmra.mrb[28].mxu1 %vm631_vm2, %v3503_v25 }
 0xe08   :  { %6420 = vmatprep.mubr.msk.f32.mxu1 %vm6814_vm1, %v6812_v13 }
 0xed2   :  { %v3648_v26 = vpop.f32.mrb[24].mxu1  ;;  %v3800_v1 = vpop.f32.mrb[18].mxu0 }
 0xed3   :  { %v3649_v27 = vadd.f32 %v3648_v26, %v7055_v47  ;;  %v6397_v28 = vpop.f32.mrb[25].mxu1  ;;  %v6407_v29 = vpop.f32.mrb[19].mxu0  ;;  %v3801_v36 = vadd.f32 %v3800_v1, %v7055_v47 }
 0xed5   :  { %v3880_v30 = vsel %vm631_vm2, %v3649_v27, -inf  ;;  %v3886_v41 = vsel %vm631_vm2, %v3801_v36, -inf }
 0xed6   :  { %3881 = vmax.xlane.f32.xlu1 %v3880_v30  ;;  %v3724_v32 = vpop.f32.mrb[26].mxu1 }
 0xed7   :  { %v3725_v33 = vadd.f32 %v3724_v32, %v7055_v47  ;;  %v6402_v35 = vpop.f32.mrb[27].mxu1 }
 0xed9   :  { %v3883_v37 = vsel %vm631_vm2, %v3725_v33, -inf }
 0xeda   :  { %3884 = vmax.xlane.f32.xlu0 %v3883_v37  ;;  %v3876_v38 = vpop.f32.mrb[28].mxu1 }
 0xedb   :  { %v6412_v40 = vpop.f32.mrb[29].mxu1  ;;  %v7539_v43 = vadd.f32 %v3876_v38, %v7055_v47 }
 0xedd   :  { %v3889_v44 = vsel %vm631_vm2, %v7539_v43, -inf }
 0xede   :  { %3887 = vmax.xlane.f32.xlu0 %v3886_v41 }
 0xee7   :  { %3159 = vrot.lane.b32.xlu1 %v7450_v19, %s6817_s1 }
 0xeeb   :  { %3162 = vrot.lane.b32.xlu1 %v7450_v19, %s6818_s23 }
 0xef4   :  { %3156 = vrot.lane.b32.xlu0 %v7450_v19, %s6819_s24 }
 0xef8   :  { %3165 = vrot.lane.b32.xlu0 %v7450_v19, %s6820_s26 }
 0xefc   :  { %4380 = vrot.lane.b32.xlu0 %v7448_v0, %s6809_s19 }
 0xf00   :  { %4386 = vrot.lane.b32.xlu0 %v7448_v0, %s6808_s18 }
 0xf0f   :  { %3890 = vmax.xlane.f32.xlu1 %v3889_v44 }
 0xf20   :  { %4377 = vrot.lane.b32.xlu1 %v7448_v0, %s6807_s17 }
 0xf24   :  { %4383 = vrot.lane.b32.xlu1 %v7448_v0, %s6806_s15  ;;  %s7918_s15 = smov 8  }
 0xf28   :  { %4368 = vrot.lane.b32.xlu1 %v7448_v0, %s6811_s16 }
 0xf63   :  { %v3882_v19 = vpop.xlane.xlu1 %3881 }
 0xf64   :  { %v3892_v48 = vsub.f32 %v3649_v27, %v3882_v19 }
 0xf66   :  { %v3896_v49 = vmul.f32 1.442695, %v3892_v48 }
 0xf67   :  { %v3885_v50 = vpop.xlane.xlu0 %3884  ;;  %v3160_v14 = vpop.permute.xlu1 %3159 }
 0xf68   :  { %6661 = vpow2.f32 %v3896_v49  ;;  %v3893_v47 = vsub.f32 %v3725_v33, %v3885_v50 }
 0xf6a   :  { %v3898_v51 = vmul.f32 1.442695, %v3893_v47 }
 0xf6b   :  { %v3888_v52 = vpop.xlane.xlu0 %3887  ;;  %v3163_v55 = vpop.permute.xlu1 %3162 }
 0xf6c   :  { %6663 = vpow2.f32 %v3898_v51  ;;  %v3894_v53 = vsub.f32 %v3801_v36, %v3888_v52 }
 0xf6e   :  { %v3900_v54 = vmul.f32 1.442695, %v3894_v53 }
 0xf6f   :  { %v3157_v22 = vpop.permute.xlu0 %3156 }
 0xf70   :  { %6665 = vpow2.f32 %v3900_v54  ;;  %v3304_v57 = vcombine.low %v3157_v22, %v3163_v55  ;;  %v3305_v61 = vcombine.high %v3157_v22, %v3163_v55 }
 0xf72   :  { %v7549_v56 = vpop.eup %6661  ;;  %v3312_v39 = vrot.slane %v3304_v57, %v6989_v24  ;;  %v3319_v42 = vrot.slane %v3305_v61, %v6989_v24 }
 0xf73   :  { %v3166_v63 = vpop.permute.xlu0 %3165  ;;  %v3904_v4 = vsel %vm631_vm2, %v7549_v56, 0.0 }
 0xf74   :  { %v3320_v5 = vcombine.low %v3160_v14, %v3166_v63  ;;  %v3321_v59 = vcombine.high %v3160_v14, %v3166_v63  ;;  %3905 = vadd.xlane.f32.xlu0 %v3904_v4 }
 0xf76   :  { %v7553_v60 = vpop.eup %6663  ;;  %v3328_v45 = vrot.slane %v3320_v5, %v6989_v24  ;;  %v3335_v12 = vrot.slane %v3321_v59, %v6989_v24 }
 0xf77   :  { %v3907_v3 = vsel %vm631_vm2, %v7553_v60, 0.0  ;;  %v4381_v51 = vpop.permute.xlu0 %4380 }
 0xf78   :  { %v3336_v6 = vcombine.low %v3312_v39, %v3328_v45  ;;  %v3337_v7 = vcombine.high %v3312_v39, %v3328_v45  ;;  %v3352_v8 = vcombine.low %v3319_v42, %v3335_v12  ;;  %v3353_v9 = vcombine.high %v3319_v42, %v3335_v12  ;;  %3908 = vadd.xlane.f32.xlu1 %v3907_v3 }
 0xf7a   :  { %v7561_v11 = vpop.eup %6665  ;;  %v3344_v62 = vrot.slane %v3336_v6, %v6992_v31  ;;  %v3351_v15 = vrot.slane %v3337_v7, %v6992_v31  ;;  %v3360_v16 = vrot.slane %v3352_v8, %v6992_v31  ;;  %v3367_v46 = vrot.slane %v3353_v9, %v6992_v31 }
 0xf7b   :  { %v3910_v17 = vsel %vm631_vm2, %v7561_v11, 0.0  ;;  %v4387_v52 = vpop.permute.xlu0 %4386 }
 0xf7c   :  { %v3508_v18 = vcombine.low %v3344_v62, %v3351_v15  ;;  %v6077_v10 = vcombine.high %v3344_v62, %v3351_v15  ;;  %v3524_v20 = vcombine.low %v3360_v16, %v3367_v46  ;;  %v6078_v21 = vcombine.high %v3360_v16, %v3367_v46  ;;  %3911 = vadd.xlane.f32.xlu0 %v3910_v17 }
 0xf7d   :  { %v4449_v22 = vcombine.low %v4381_v51, %v4387_v52  ;;  %v4450_v55 = vcombine.high %v4381_v51, %v4387_v52 }
 0xf7e   :  { %v3515_v23 = vrot.slane %v3508_v18, %v6989_v24  ;;  %v3523_v25 = vrot.slane %v6077_v10, %v6989_v24  ;;  %v3531_v26 = vrot.slane %v3524_v20, %v6989_v24  ;;  %v3539_v1 = vrot.slane %v6078_v21, %v6989_v24 }
 0xf7f   :  { %v4457_v61 = vrot.slane %v4449_v22, %v6989_v24  ;;  %v4464_v63 = vrot.slane %v4450_v55, %v6989_v24 }
 0xf80   :  { %v3540_v27 = vcombine.low %v3515_v23, %v3523_v25  ;;  %v3556_v28 = vcombine.low %v3531_v26, %v3539_v1  ;;  %v3541_v29 = vcombine.high %v3515_v23, %v3523_v25  ;;  %v3557_v30 = vcombine.high %v3531_v26, %v3539_v1 }
 0xf82   :  { %v3548_v32 = vrot.slane %v3540_v27, %v6992_v31  ;;  %v3564_v33 = vrot.slane %v3556_v28, %v6992_v31  ;;  %v7576_v35 = vrot.slane %v3541_v29, %v6992_v31  ;;  %v7579_v36 = vrot.slane %v3557_v30, %v6992_v31 }
 0xf84   :  { %v3572_v37 = vcombine.low %v3548_v32, %v3564_v33  ;;  %v3573_v38 = vcombine.high %v3548_v32, %v3564_v33  ;;  %v3574_v40 = vcombine.low %v7576_v35, %v7579_v36  ;;  %v3575_v41 = vcombine.high %v7576_v35, %v7579_v36 }
 0xf86   :  { %6414 = vmatpush3.msra.mxu0 %v3572_v37  ;;  %6419 = vmatpush3.msra.mxu1 %v3573_v38 }
 0xf87   :  { %6423 = vmatprep.subr.mxu0 %v6812_v13  ;;  %6428 = vmatprep.subr.mxu1 %v6812_v13 }
 0xf92   :  { %4371 = vrot.lane.b32.xlu0 %v7448_v0, %s6810_s0 }
 0xf9c   :  { %v3891_v44 = vpop.xlane.xlu1 %3890 }
 0xf9d   :  { %v3895_v19 = vsub.f32 %v7539_v43, %v3891_v44 }
 0xf9f   :  { %v3902_v48 = vmul.f32 1.442695, %v3895_v19 }
 0xfa0   :  { %v4378_v47 = vpop.permute.xlu1 %4377 }
 0xfa1   :  { %6667 = vpow2.f32 %v3902_v48 }
 0xfa4   :  { %v4384_v14 = vpop.permute.xlu1 %4383 }
 0xfa5   :  { %v4433_v53 = vcombine.low %v4378_v47, %v4384_v14  ;;  %v4434_v54 = vcombine.high %v4378_v47, %v4384_v14 }
 0xfa7   :  { %v4441_v43 = vrot.slane %v4433_v53, %v6989_v24  ;;  %v4448_v57 = vrot.slane %v4434_v54, %v6989_v24 }
 0xfa8   :  { %v4369_v12 = vpop.permute.xlu1 %4368 }
 0xfa9   :  { %v4497_v4 = vcombine.low %v4441_v43, %v4457_v61  ;;  %v4498_v5 = vcombine.high %v4441_v43, %v4457_v61  ;;  %v4513_v59 = vcombine.low %v4448_v57, %v4464_v63  ;;  %v4514_v39 = vcombine.high %v4448_v57, %v4464_v63 }
 0xfab   :  { %v7590_v49 = vpop.eup %6667  ;;  %v4505_v42 = vrot.slane %v4497_v4, %v6992_v31  ;;  %v4512_v45 = vrot.slane %v4498_v5, %v6992_v31  ;;  %v4521_v6 = vrot.slane %v4513_v59, %v6992_v31  ;;  %v4528_v7 = vrot.slane %v4514_v39, %v6992_v31 }
 0xfac   :  { %v3913_v50 = vsel %vm631_vm2, %v7590_v49, 0.0 }
 0xfad   :  { %3914 = vadd.xlane.f32.xlu1 %v3913_v50  ;;  %v6094_v8 = vcombine.low %v4505_v42, %v4512_v45  ;;  %v6096_v62 = vcombine.high %v4505_v42, %v4512_v45  ;;  %v6098_v15 = vcombine.low %v4521_v6, %v4528_v7  ;;  %v6100_v16 = vcombine.high %v4521_v6, %v4528_v7 }
 0xfaf   :  { %v7605_v46 = vrot.slane %v6094_v8, %v6989_v24  ;;  %v7608_v18 = vrot.slane %v6096_v62, %v6989_v24  ;;  %v7611_v10 = vrot.slane %v6098_v15, %v6989_v24  ;;  %v7614_v20 = vrot.slane %v6100_v16, %v6989_v24 }
 0xfb1   :  { %v4685_v25 = vcombine.low %v7605_v46, %v7608_v18  ;;  %v4717_v26 = vcombine.low %v7611_v10, %v7614_v20  ;;  %v4686_v5 = vcombine.high %v7605_v46, %v7608_v18  ;;  %v4718_v59 = vcombine.high %v7611_v10, %v7614_v20 }
 0xfb3   :  { %v4693_v28 = vrot.slane %v4685_v25, %v6992_v31  ;;  %v4700_v8 = vrot.slane %v4686_v5, %v6992_v31 }
 0xfbe   :  { %4374 = vrot.lane.b32.xlu1 %v7448_v0, %s6813_s20 }
0x1001   :  { %v3906_v3 = vpop.xlane.xlu0 %3905 }
0x1002   :  { %6669 = vrcp.f32 %v3906_v3 }
0x1005   :  { %v3909_v9 = vpop.xlane.xlu1 %3908 }
0x1006   :  { %6671 = vrcp.f32 %v3909_v9  ;;  %v4732_v9 = vrot.slane %v4718_v59, %v6992_v31 }
0x1008   :  { %v4739_v10 = vcombine.low %v4700_v8, %v4732_v9  ;;  %v4740_v20 = vcombine.high %v4700_v8, %v4732_v9 }
0x1009   :  { %v3912_v17 = vpop.xlane.xlu0 %3911 }
0x100a   :  { %6673 = vrcp.f32 %v3912_v17 }
0x100c   :  { %v6670_v21 = vpop.eup %6669 }
0x100d   :  { %v3920_v23 = vmul.f32 %v6670_v21, %v7549_v56  ;;  %v4725_v56 = vrot.slane %v4717_v26, %v6992_v31 }
0x100f   :  { %6416 = vmatmul.mubr.msk.f32.vlgmr.msra.gmra.mrb[20].mxu0 %vm631_vm2, %v3920_v23  ;;  %v4737_v32 = vcombine.low %v4693_v28, %v4725_v56  ;;  %v4738_v43 = vcombine.high %v4693_v28, %v4725_v56 }
0x1010   :  { %v6672_v1 = vpop.eup %6671  ;;  %6424 = vmatpush3.msra.mxu0 %v3574_v40  ;;  %6425 = vmatprep.mubr.msk.f32.mxu0 %vm6814_vm1, %v6812_v13 }
0x1011   :  { %v3921_v27 = vmul.f32 %v6672_v1, %v7553_v60  ;;  %6433 = vmatprep.subr.mxu0 %v6812_v13  ;;  %v4372_v60 = vpop.permute.xlu0 %4371 }
0x1012   :  { %v4401_v35 = vcombine.low %v7448_v0, %v4372_v60  ;;  %v4402_v36 = vcombine.high %v7448_v0, %v4372_v60 }
0x1013   :  { %6421 = vmatmul.mubr.msk.f32.vlgmr.msra.gmra.mrb[30].mxu1 %vm631_vm2, %v3921_v27 }
0x1014   :  { %v6674_v29 = vpop.eup %6673  ;;  %6429 = vmatpush3.msra.mxu1 %v3575_v41  ;;  %6430 = vmatprep.mubr.msk.f32.mxu1 %vm6814_vm1, %v6812_v13  ;;  %v4409_v40 = vrot.slane %v4401_v35, %v6989_v24  ;;  %v4416_v41 = vrot.slane %v4402_v36, %v6989_v24 }
0x1015   :  { %v3922_v30 = vmul.f32 %v6674_v29, %v7561_v11  ;;  %6438 = vmatprep.subr.mxu1 %v6812_v13 }
0x1017   :  { %6426 = vmatmul.mubr.msk.f32.vlgmr.msra.gmra.mrb[22].mxu0 %vm631_vm2, %v3922_v30 }
0x1018   :  { %6434 = vmatpush3.xpose.msk.msra.mxu0 %vm631_vm2, %v4737_v32  ;;  %6435 = vmatprep.mubr.msk.f32.mxu0 %vm6814_vm1, %v6812_v13 }
0x1019   :  { %6443 = vmatprep.subr.mxu0 %v6812_v13 }
0x103a   :  { %v3915_v33 = vpop.xlane.xlu1 %3914 }
0x103b   :  { %6675 = vrcp.f32 %v3915_v33 }
0x103e   :  { %v4375_v11 = vpop.permute.xlu1 %4374 }
0x103f   :  { %v4417_v37 = vcombine.low %v4369_v12, %v4375_v11  ;;  %v4418_v38 = vcombine.high %v4369_v12, %v4375_v11 }
0x1041   :  { %v4425_v44 = vrot.slane %v4417_v37, %v6989_v24  ;;  %v4432_v19 = vrot.slane %v4418_v38, %v6989_v24 }
0x1043   :  { %v4465_v48 = vcombine.low %v4409_v40, %v4425_v44  ;;  %v4466_v50 = vcombine.high %v4409_v40, %v4425_v44  ;;  %v4481_v47 = vcombine.low %v4416_v41, %v4432_v19  ;;  %v4482_v51 = vcombine.high %v4416_v41, %v4432_v19 }
0x1045   :  { %v6676_v14 = vpop.eup %6675  ;;  %v4473_v52 = vrot.slane %v4465_v48, %v6992_v31  ;;  %v4480_v53 = vrot.slane %v4466_v50, %v6992_v31  ;;  %v4489_v54 = vrot.slane %v4481_v47, %v6992_v31  ;;  %v4496_v22 = vrot.slane %v4482_v51, %v6992_v31 }
0x1046   :  { %v3923_v55 = vmul.f32 %v6676_v14, %v7590_v49 }
0x1047   :  { %v6093_v57 = vcombine.low %v4473_v52, %v4480_v53  ;;  %v6095_v61 = vcombine.high %v4473_v52, %v4480_v53  ;;  %v6097_v63 = vcombine.low %v4489_v54, %v4496_v22  ;;  %v6099_v4 = vcombine.high %v4489_v54, %v4496_v22 }
0x1048   :  { %6431 = vmatmul.mubr.msk.f32.vlgmr.msra.gmra.mrb[32].mxu1 %vm631_vm2, %v3923_v55 }
0x1049   :  { %v4613_v39 = vrot.slane %v6093_v57, %v6989_v24  ;;  %v4629_v42 = vrot.slane %v6095_v61, %v6989_v24  ;;  %v4645_v45 = vrot.slane %v6097_v63, %v6989_v24  ;;  %v4661_v49 = vrot.slane %v6099_v4, %v6989_v24  ;;  %6439 = vmatpush3.xpose.msk.msra.mxu1 %vm631_vm2, %v4738_v43 }
0x104a   :  { %6440 = vmatprep.mubr.msk.f32.mxu1 %vm6814_vm1, %v6812_v13  ;;  %6448 = vmatprep.subr.mxu1 %v6812_v13 }
0x104b   :  { %v4669_v12 = vcombine.low %v4613_v39, %v4629_v42  ;;  %v4670_v3 = vcombine.high %v4613_v39, %v4629_v42  ;;  %v4701_v6 = vcombine.low %v4645_v45, %v4661_v49  ;;  %v4702_v7 = vcombine.high %v4645_v45, %v4661_v49 }
0x104d   :  { %v4677_v62 = vrot.slane %v4669_v12, %v6992_v31  ;;  %v4709_v15 = vrot.slane %v4701_v6, %v6992_v31  ;;  %v4684_v17 = vrot.slane %v4670_v3, %v6992_v31  ;;  %v4716_v18 = vrot.slane %v4702_v7, %v6992_v31 }
0x104f   :  { %v4733_v16 = vcombine.low %v4677_v62, %v4709_v15  ;;  %v4734_v46 = vcombine.high %v4677_v62, %v4709_v15  ;;  %v4735_v21 = vcombine.low %v4684_v17, %v4716_v18  ;;  %v4736_v23 = vcombine.high %v4684_v17, %v4716_v18 }
0x1051   :  { %6436 = vmatmul.mubr.msk.f32.vlgmr.msra.gmra.mrb[24].mxu0 %vm631_vm2, %v4733_v16  ;;  %6441 = vmatmul.mubr.msk.f32.vlgmr.msra.gmra.mrb[34].mxu1 %vm631_vm2, %v4734_v46 }
0x1052   :  { %6444 = vmatpush3.xpose.msk.msra.mxu0 %vm631_vm2, %v4739_v10  ;;  %6449 = vmatpush3.xpose.msk.msra.mxu1 %vm631_vm2, %v4740_v20 }
0x1053   :  { %6445 = vmatprep.mubr.msk.f32.mxu0 %vm6814_vm1, %v6812_v13  ;;  %6450 = vmatprep.mubr.msk.f32.mxu1 %vm6814_vm1, %v6812_v13 }
0x1054   :  { %6453 = vmatprep.subr.mxu0 %v6812_v13  ;;  %6458 = vmatprep.subr.mxu1 %v6812_v13 }
0x1055   :  { %6446 = vmatmul.mubr.msk.f32.vlgmr.msra.gmra.mrb[26].mxu0 %vm631_vm2, %v4735_v21  ;;  %6451 = vmatmul.mubr.msk.f32.vlgmr.msra.gmra.mrb[36].mxu1 %vm631_vm2, %v4736_v23 }
0x1056   :  { %6455 = vmatprep.mubr.msk.f32.mxu0 %vm6814_vm1, %v6812_v13  ;;  %6460 = vmatprep.mubr.msk.f32.mxu1 %vm6814_vm1, %v6812_v13 }
0x10e2   :  { %v3993_v25 = vpop.f32.mrb[20].mxu0 }
0x10e3   :  { %v6417_v26 = vpop.f32.mrb[21].mxu0 }
0x10e6   :  { %v4066_v1 = vpop.f32.mrb[30].mxu1 }
0x10e7   :  { %v6422_v27 = vpop.f32.mrb[31].mxu1 }
0x10ea   :  { %v4139_v28 = vpop.f32.mrb[22].mxu0 }
0x10eb   :  { %v4216_v56 = vcombine.low %v3993_v25, %v4139_v28  ;;  %v4217_v29 = vcombine.high %v3993_v25, %v4139_v28  ;;  %v6427_v30 = vpop.f32.mrb[23].mxu0 }
0x10ed   :  { %v4224_v36 = vrot.slane %v4216_v56, %v6989_v24  ;;  %v4231_v11 = vrot.slane %v4217_v29, %v6989_v24 }
0x111b   :  { %v4212_v32 = vpop.f32.mrb[32].mxu1 }
0x111c   :  { %v4232_v60 = vcombine.low %v4066_v1, %v4212_v32  ;;  %v4233_v33 = vcombine.high %v4066_v1, %v4212_v32  ;;  %v6432_v35 = vpop.f32.mrb[33].mxu1 }
0x111e   :  { %v4240_v37 = vrot.slane %v4232_v60, %v6989_v24  ;;  %v4247_v38 = vrot.slane %v4233_v33, %v6989_v24 }
0x1120   :  { %v4248_v40 = vcombine.low %v4224_v36, %v4240_v37  ;;  %v4249_v41 = vcombine.high %v4224_v36, %v4240_v37  ;;  %v4264_v44 = vcombine.low %v4231_v11, %v4247_v38  ;;  %v4265_v19 = vcombine.high %v4231_v11, %v4247_v38 }
0x1122   :  { %v4256_v48 = vrot.slane %v4248_v40, %v6992_v31  ;;  %v4263_v50 = vrot.slane %v4249_v41, %v6992_v31  ;;  %v4272_v47 = vrot.slane %v4264_v44, %v6992_v31  ;;  %v4279_v51 = vrot.slane %v4265_v19, %v6992_v31 }
0x1124   :  { %v4284_v14 = vcombine.low %v4256_v48, %v4263_v50  ;;  %v6091_v52 = vcombine.high %v4256_v48, %v4263_v50  ;;  %v4300_v53 = vcombine.low %v4272_v47, %v4279_v51  ;;  %v6092_v54 = vcombine.high %v4272_v47, %v4279_v51  ;;  %v4881_v22 = vpop.f32.mrb[24].mxu0  ;;  %v4957_v55 = vpop.f32.mrb[34].mxu1 }
0x1125   :  { %v4882_v43 = vadd.f32 %v4881_v22, %v7227_v2  ;;  %v4958_v57 = vadd.f32 %v4957_v55, %v7227_v2  ;;  %v6437_v61 = vpop.f32.mrb[25].mxu0  ;;  %v6442_v63 = vpop.f32.mrb[35].mxu1 }
0x1126   :  { %v4291_v4 = vrot.slane %v4284_v14, %v6989_v24  ;;  %v4299_v5 = vrot.slane %v6091_v52, %v6989_v24  ;;  %v4307_v59 = vrot.slane %v4300_v53, %v6989_v24  ;;  %v4315_v39 = vrot.slane %v6092_v54, %v6989_v24 }
0x1127   :  { %v5113_v42 = vsel %vm631_vm2, %v4882_v43, -inf  ;;  %v5116_v45 = vsel %vm631_vm2, %v4958_v57, -inf }
0x1128   :  { %5114 = vmax.xlane.f32.xlu0 %v5113_v42  ;;  %v5033_v49 = vpop.f32.mrb[26].mxu0  ;;  %5117 = vmax.xlane.f32.xlu1 %v5116_v45  ;;  %v5109_v12 = vpop.f32.mrb[36].mxu1  ;;  %v4317_v3 = vcombine.high %v4291_v4, %v4299_v5  ;;  %v4333_v6 = vcombine.high %v4307_v59, %v4315_v39  ;;  %v4316_v7 = vcombine.low %v4291_v4, %v4299_v5 }
0x1129   :  { %v5034_v8 = vadd.f32 %v5033_v49, %v7227_v2  ;;  %v6447_v9 = vpop.f32.mrb[27].mxu0  ;;  %v6452_v62 = vpop.f32.mrb[37].mxu1  ;;  %v4332_v15 = vcombine.low %v4307_v59, %v4315_v39  ;;  %v5110_v18 = vadd.f32 %v5109_v12, %v7227_v2 }
0x112a   :  { %v4331_v16 = vrot.slane %v4317_v3, %v6992_v31  ;;  %v4347_v46 = vrot.slane %v4333_v6, %v6992_v31  ;;  %v7704_v17 = vrot.slane %v4316_v7, %v6992_v31 }
0x112b   :  { %v5119_v10 = vsel %vm631_vm2, %v5034_v8, -inf  ;;  %v7709_v20 = vrot.slane %v4332_v15, %v6992_v31  ;;  %v5122_v1 = vsel %vm631_vm2, %v5110_v18, -inf }
0x112c   :  { %5120 = vmax.xlane.f32.xlu0 %v5119_v10  ;;  %v4350_v21 = vcombine.low %v4331_v16, %v4347_v46  ;;  %v4351_v23 = vcombine.high %v4331_v16, %v4347_v46 }
0x112d   :  { %v4348_v25 = vcombine.low %v7704_v17, %v7709_v20  ;;  %v4349_v26 = vcombine.high %v7704_v17, %v7709_v20 }
0x1130   :  { %5123 = vmax.xlane.f32.xlu0 %v5122_v1 }
0x1139   :  { %4389 = vrot.lane.b32.xlu1 %v7448_v0, %s6819_s24 }
0x11b5   :  { %v5115_v2 = vpop.xlane.xlu0 %5114  ;;  %v5118_v27 = vpop.xlane.xlu1 %5117 }
0x11b6   :  { %v5125_v28 = vsub.f32 %v4882_v43, %v5115_v2  ;;  %v5126_v56 = vsub.f32 %v4958_v57, %v5118_v27 }
0x11b8   :  { %v5129_v29 = vmul.f32 1.442695, %v5125_v28  ;;  %v5131_v30 = vmul.f32 1.442695, %v5126_v56 }
0x11b9   :  { %v5121_v32 = vpop.xlane.xlu0 %5120  ;;  %v4390_v47 = vpop.permute.xlu1 %4389 }
0x11ba   :  { %6677 = vpow2.f32 %v5129_v29  ;;  %v5127_v60 = vsub.f32 %v5034_v8, %v5121_v32 }
0x11bb   :  { %6679 = vpow2.f32 %v5131_v30 }
0x11bc   :  { %v5133_v33 = vmul.f32 1.442695, %v5127_v60 }
0x11bd   :  { %v5124_v35 = vpop.xlane.xlu0 %5123 }
0x11be   :  { %6681 = vpow2.f32 %v5133_v33  ;;  %v5128_v36 = vsub.f32 %v5110_v18, %v5124_v35 }
0x11c0   :  { %v5135_v11 = vmul.f32 1.442695, %v5128_v36 }
0x11c2   :  { %6683 = vpow2.f32 %v5135_v11 }
0x11c4   :  { %v7718_v37 = vpop.eup %6677 }
0x11c5   :  { %v7720_v38 = vpop.eup %6679  ;;  %v5137_v40 = vsel %vm631_vm2, %v7718_v37, 0.0 }
0x11c6   :  { %5138 = vadd.xlane.f32.xlu1 %v5137_v40  ;;  %v5140_v41 = vsel %vm631_vm2, %v7720_v38, 0.0 }
0x11c7   :  { %5141 = vadd.xlane.f32.xlu0 %v5140_v41 }
0x11c8   :  { %v7726_v44 = vpop.eup %6681 }
0x11c9   :  { %v5143_v19 = vsel %vm631_vm2, %v7726_v44, 0.0 }
0x11ca   :  { %5144 = vadd.xlane.f32.xlu1 %v5143_v19 }
0x11cc   :  { %v7730_v48 = vpop.eup %6683 }
0x11cd   :  { %v5146_v50 = vsel %vm631_vm2, %v7730_v48, 0.0 }
0x11ce   :  { %5147 = vadd.xlane.f32.xlu0 %v5146_v50 }
0x11db   :  { %4395 = vrot.lane.b32.xlu1 %v7448_v0, %s6818_s23 }
0x11df   :  { %4398 = vrot.lane.b32.xlu1 %v7448_v0, %s6820_s26 }
0x11e3   :  { %4357 = vrot.lane.b32.xlu1 %v4350_v21, %s6821_s27 }
0x11e4   :  { %4392 = vrot.lane.b32.xlu0 %v7448_v0, %s6817_s1 }
0x11e7   :  { %4361 = vrot.lane.b32.xlu1 %v4351_v23, %s7917_s3 }
0x11e8   :  { %4353 = vrot.lane.b32.xlu0 %v4349_v26, %s7918_s15 }
0x1253   :  { %v5139_v51 = vpop.xlane.xlu1 %5138 }
0x1254   :  { %v5142_v14 = vpop.xlane.xlu0 %5141  ;;  %6685 = vrcp.f32 %v5139_v51 }
0x1255   :  { %6687 = vrcp.f32 %v5142_v14 }
0x1257   :  { %v5145_v52 = vpop.xlane.xlu1 %5144 }
0x1258   :  { %6689 = vrcp.f32 %v5145_v52 }
0x125b   :  { %v4396_v53 = vpop.permute.xlu1 %4395  ;;  %v5148_v54 = vpop.xlane.xlu0 %5147 }
0x125c   :  { %v4537_v22 = vcombine.low %v4390_v47, %v4396_v53  ;;  %v4538_v55 = vcombine.high %v4390_v47, %v4396_v53  ;;  %6691 = vrcp.f32 %v5148_v54 }
0x125e   :  { %v4545_v4 = vrot.slane %v4537_v22, %v6989_v24  ;;  %v4552_v0 = vrot.slane %v4538_v55, %v6989_v24  ;;  %v6686_v21 = vpop.eup %6685 }
0x125f   :  { %v4399_v43 = vpop.permute.xlu1 %4398  ;;  %v4393_v57 = vpop.permute.xlu0 %4392  ;;  %v5153_v40 = vmul.f32 %v6686_v21, %v7718_v37 }
0x1260   :  { %v4553_v61 = vcombine.low %v4393_v57, %v4399_v43  ;;  %v4554_v63 = vcombine.high %v4393_v57, %v4399_v43  ;;  %v6688_v27 = vpop.eup %6687 }
0x1261   :  { %v5154_v41 = vmul.f32 %v6688_v27, %v7720_v38 }
0x1262   :  { %v4561_v5 = vrot.slane %v4553_v61, %v6989_v24  ;;  %v4568_v59 = vrot.slane %v4554_v63, %v6989_v24  ;;  %v6690_v30 = vpop.eup %6689 }
0x1263   :  { %v4358_v28 = vpop.permute.xlu1 %4357  ;;  %v4354_v33 = vpop.permute.xlu0 %4353  ;;  %v5155_v37 = vmul.f32 %v6690_v30, %v7726_v44  ;;  %v5601_v44 = vld [vmem:[%s7901_s4 + $0x8] sm:$0xff] }
0x1264   :  { %v4569_v39 = vcombine.low %v4545_v4, %v4561_v5  ;;  %v4570_v42 = vcombine.high %v4545_v4, %v4561_v5  ;;  %v4585_v45 = vcombine.low %v4552_v0, %v4568_v59  ;;  %v4586_v49 = vcombine.high %v4552_v0, %v4568_v59 }
0x1265   :  { %v4364_v19 = vsel %vm631_vm2, %v4348_v25, %v4354_v33  ;;  %v5600_v25 = vld [vmem:[%s7901_s4] sm:$0xff] }
0x1266   :  { %v4577_v12 = vrot.slane %v4569_v39, %v6992_v31  ;;  %v4584_v3 = vrot.slane %v4570_v42, %v6992_v31  ;;  %v4593_v6 = vrot.slane %v4585_v45, %v6992_v31  ;;  %v4600_v7 = vrot.slane %v4586_v49, %v6992_v31  ;;  %v6692_v11 = vpop.eup %6691 }
0x1267   :  { %v4362_v51 = vpop.permute.xlu1 %4361  ;;  %v5156_v38 = vmul.f32 %v6692_v11, %v7730_v48  ;;  %v4365_v17 = vsel %vm1421_vm3, %v4364_v19, %v4358_v28  ;;  %v6562_v48 = vpack.c.bf16 %v5601_v44, %v5600_v25 }
0x1268   :  { %v4741_v8 = vcombine.low %v4577_v12, %v4584_v3  ;;  %v6101_v9 = vcombine.high %v4577_v12, %v4584_v3  ;;  %v4757_v62 = vcombine.low %v4593_v6, %v4600_v7  ;;  %v6102_v15 = vcombine.high %v4593_v6, %v4600_v7  ;;  %v5602_v3 = vld [vmem:[%s7901_s4 + $0x10] sm:$0xff]  ;;  %v5603_v6 = vld [vmem:[%s7901_s4 + $0x18] sm:$0xff] }
0x1269   :  { %v4366_v20 = vsel %vm1423_vm4, %v4365_v17, %v4362_v51 }
0x126a   :  { %v4748_v16 = vrot.slane %v4741_v8, %v6989_v24  ;;  %v4756_v46 = vrot.slane %v6101_v9, %v6989_v24  ;;  %v4764_v18 = vrot.slane %v4757_v62, %v6989_v24  ;;  %v4772_v10 = vrot.slane %v6102_v15, %v6989_v24 }
0x126b   :  { %v6566_v15 = vpack.c.bf16 %v5603_v6, %v5602_v3  ;;  %v6120_v6 = vld [vmem:[%s7903_s6] ss:$0 sm:$0xff] }
0x126c   :  { %v4773_v23 = vcombine.low %v4748_v16, %v4756_v46  ;;  %v4789_v26 = vcombine.low %v4764_v18, %v4772_v10  ;;  %v4774_v1 = vcombine.high %v4748_v16, %v4756_v46  ;;  %v4790_v2 = vcombine.high %v4764_v18, %v4772_v10 }
0x126e   :  { %v4781_v56 = vrot.slane %v4773_v23, %v6992_v31  ;;  %v4797_v29 = vrot.slane %v4789_v26, %v6992_v31  ;;  %v4788_v32 = vrot.slane %v4774_v1, %v6992_v31  ;;  %v4804_v60 = vrot.slane %v4790_v2, %v6992_v31 }
0x1270   :  { %v4805_v35 = vcombine.low %v4781_v56, %v4797_v29  ;;  %v4806_v36 = vcombine.high %v4781_v56, %v4797_v29  ;;  %v4807_v50 = vcombine.low %v4788_v32, %v4804_v60  ;;  %v4808_v47 = vcombine.high %v4788_v32, %v4804_v60 }
0x1272   :  { %6454 = vmatpush3.msra.mxu0 %v4805_v35  ;;  %6459 = vmatpush3.msra.mxu1 %v4806_v36 }
0x1273   :  { %6456 = vmatmul.mubr.msk.f32.vlgmr.msra.gmra.mrb[28].mxu0 %vm631_vm2, %v5153_v40  ;;  %6461 = vmatmul.mubr.msk.f32.vlgmr.msra.gmra.mrb[38].mxu1 %vm631_vm2, %v5154_v41 }
0x1274   :  { %6463 = vmatprep.subr.mxu0 %v6812_v13  ;;  %6468 = vmatprep.subr.mxu1 %v6812_v13 }
0x1275   :  { %6464 = vmatpush3.msra.mxu0 %v4807_v50  ;;  %6469 = vmatpush3.msra.mxu1 %v4808_v47 }
0x1276   :  { %6465 = vmatprep.mubr.msk.f32.mxu0 %vm6814_vm1, %v6812_v13  ;;  %6470 = vmatprep.mubr.msk.f32.mxu1 %vm6814_vm1, %v6812_v13 }
0x1277   :  { %6466 = vmatmul.mubr.msk.f32.vlgmr.msra.gmra.mrb[30].mxu0 %vm631_vm2, %v5155_v37  ;;  %6471 = vmatmul.mubr.msk.f32.vlgmr.msra.gmra.mrb[40].mxu1 %vm631_vm2, %v5156_v38 }
0x1278   :  { %6481 = vmatprep.mubr.msk.f32.mxu0 %vm107_vm0, %v4366_v20  ;;  %6563 = vmatprep.subr.bf16.mxu0 %v6562_v48 }
0x1279   :  { %6565 = vmatpush3.bf16.msra.mxu0 %v6562_v48 }
0x127a   :  { %6567 = vmatprep.subr.bf16.mxu0 %v6566_v15 }
0x127d   :  { %6569 = vmatpush3.bf16.msra.mxu0 %v6566_v15 }
0x1346   :  { %v5226_v13 = vpop.f32.mrb[28].mxu0  ;;  %v5299_v14 = vpop.f32.mrb[38].mxu1 }
0x1347   :  { %v6457_v52 = vpop.f32.mrb[29].mxu0  ;;  %v6462_v53 = vpop.f32.mrb[39].mxu1 }
0x134a   :  { %v5372_v54 = vpop.f32.mrb[30].mxu0  ;;  %v5445_v22 = vpop.f32.mrb[40].mxu1 }
0x134b   :  { %v5449_v55 = vcombine.low %v5226_v13, %v5372_v54  ;;  %v5450_v43 = vcombine.high %v5226_v13, %v5372_v54  ;;  %v5465_v57 = vcombine.low %v5299_v14, %v5445_v22  ;;  %v5466_v61 = vcombine.high %v5299_v14, %v5445_v22  ;;  %v6467_v63 = vpop.f32.mrb[31].mxu0  ;;  %v6472_v4 = vpop.f32.mrb[41].mxu1 }
0x134c   :  { %v5740_v4 = vld [vmem:[%s7905_s8 + $0x10] sm:$0xff] }
0x134d   :  { %v5457_v0 = vrot.slane %v5449_v55, %v6989_v24  ;;  %v5464_v5 = vrot.slane %v5450_v43, %v6989_v24  ;;  %v5473_v59 = vrot.slane %v5465_v57, %v6989_v24  ;;  %v5480_v39 = vrot.slane %v5466_v61, %v6989_v24  ;;  %v5739_v61 = vld [vmem:[%s7905_s8 + $0x8] sm:$0xff] }
0x134f   :  { %v5481_v42 = vcombine.low %v5457_v0, %v5473_v59  ;;  %v5482_v45 = vcombine.high %v5457_v0, %v5473_v59  ;;  %v5497_v49 = vcombine.low %v5464_v5, %v5480_v39  ;;  %v5498_v12 = vcombine.high %v5464_v5, %v5480_v39  ;;  %v5741_v0 = vld [vmem:[%s7905_s8 + $0x18] sm:$0xff] }
0x1350   :  { %v6574_v5 = vpack.c.bf16 %v5741_v0, %v5740_v4 }
0x1351   :  { %v5489_v7 = vrot.slane %v5481_v42, %v6992_v31  ;;  %v5496_v8 = vrot.slane %v5482_v45, %v6992_v31  ;;  %v5505_v9 = vrot.slane %v5497_v49, %v6992_v31  ;;  %v5512_v62 = vrot.slane %v5498_v12, %v6992_v31 }
0x1353   :  { %v5517_v16 = vcombine.low %v5489_v7, %v5496_v8  ;;  %v6115_v46 = vcombine.high %v5489_v7, %v5496_v8  ;;  %v5533_v18 = vcombine.low %v5505_v9, %v5512_v62  ;;  %v6116_v10 = vcombine.high %v5505_v9, %v5512_v62  ;;  %v6121_v8 = vld [vmem:[#allocation5] ss:$0 sm:$0xff] }
0x1355   :  { %v5524_v21 = vrot.slane %v5517_v16, %v6989_v24  ;;  %v5532_v23 = vrot.slane %v6115_v46, %v6989_v24  ;;  %v5540_v26 = vrot.slane %v5533_v18, %v6989_v24  ;;  %v5548_v1 = vrot.slane %v6116_v10, %v6989_v24  ;;  %v5840_v10 = vld [vmem:[%s7907_s10] sm:$0xff] }
0x1357   :  { %v5550_v2 = vcombine.high %v5524_v21, %v5532_v23  ;;  %v5566_v27 = vcombine.high %v5540_v26, %v5548_v1  ;;  %v5549_v28 = vcombine.low %v5524_v21, %v5532_v23  ;;  %v5565_v56 = vcombine.low %v5540_v26, %v5548_v1  ;;  %v5841_v21 = vld [vmem:[%s7907_s10 + $0x8] sm:$0xff]  ;;  %v5842_v26 = vld [vmem:[%s7907_s10 + $0x10] sm:$0xff]  ;;  %v5843_v1 = vld [vmem:[%s7907_s10 + $0x18] sm:$0xff] }
0x1358   :  { %v6578_v23 = vpack.c.bf16 %v5841_v21, %v5840_v10 }
0x1359   :  { %v5564_v29 = vrot.slane %v5550_v2, %v6992_v31  ;;  %v5580_v30 = vrot.slane %v5566_v27, %v6992_v31  ;;  %v5557_v32 = vrot.slane %v5549_v28, %v6992_v31  ;;  %v5573_v60 = vrot.slane %v5565_v56, %v6992_v31  ;;  %v6117_v31 = vld [vmem:[%s7902_s5] ss:$0 sm:$0xff]  ;;  %v5845_v28 = vld [vmem:[%s7907_s10 + $0x28] sm:$0xff] }
0x135a   :  { %6579 = vmatprep.subr.bf16.mxu0 %v6578_v23  ;;  %v6582_v2 = vpack.c.bf16 %v5843_v1, %v5842_v26  ;;  %v5844_v27 = vld [vmem:[%s7907_s10 + $0x20] sm:$0xff] }
0x135b   :  { %v5584_v33 = vcombine.high %v5564_v29, %v5580_v30  ;;  %v5582_v35 = vcombine.high %v5557_v32, %v5573_v60  ;;  %v5581_v36 = vcombine.low %v5557_v32, %v5573_v60  ;;  %v5583_v11 = vcombine.low %v5564_v29, %v5580_v30  ;;  %v5846_v29 = vld [vmem:[%s7907_s10 + $0x30] sm:$0xff]  ;;  %v5847_v30 = vld [vmem:[%s7907_s10 + $0x38] sm:$0xff] }
0x135c   :  { %v6586_v56 = vpack.c.bf16 %v5845_v28, %v5844_v27  ;;  %v6590_v32 = vpack.c.bf16 %v5847_v30, %v5846_v29  ;;  %v6122_v60 = vld [vmem:[#allocation7] ss:$0 sm:$0xff] }
0x135d   :  { %5594 = vrot.lane.b32.xlu1 %v5584_v33, %s7917_s3  ;;  %5586 = vrot.lane.b32.xlu0 %v5582_v35, %s7918_s15 }
0x1361   :  { %5590 = vrot.lane.b32.xlu0 %v5583_v11, %s6821_s27 }
0x13cf   :  { %v5587_v24 = vpop.permute.xlu0 %5586  ;;  %v5595_v19 = vpop.permute.xlu1 %5594 }
0x13d0   :  { %v5597_v40 = vsel %vm631_vm2, %v5581_v36, %v5587_v24 }
0x13d3   :  { %v5591_v41 = vpop.permute.xlu0 %5590 }
0x13d4   :  { %v5598_v50 = vsel %vm1421_vm3, %v5597_v40, %v5591_v41 }
0x13d5   :  { %v5599_v47 = vsel %vm1423_vm4, %v5598_v50, %v5595_v19 }
0x13d6   :  { %6482 = vmatmul.mubr.msk.f32.vlgmr.msra.gmra.mrb[32].mxu0 %vm107_vm0, %v5599_v47 }
0x13d7   :  { %6581 = vmatpush3.bf16.msra.mxu0 %v6578_v23 }
0x13d8   :  { %6583 = vmatprep.subr.bf16.mxu0 %v6582_v2 }
0x13db   :  { %6585 = vmatpush3.bf16.msra.mxu0 %v6582_v2 }
0x13dc   :  { %6587 = vmatprep.subr.bf16.mxu0 %v6586_v56 }
0x13df   :  { %6589 = vmatpush3.bf16.msra.mxu0 %v6586_v56 }
0x13e0   :  { %6591 = vmatprep.subr.bf16.mxu0 %v6590_v32 }
0x13e3   :  { %6593 = vmatpush3.bf16.msra.mxu0 %v6590_v32 }
0x14a9   :  { %v6483_v51 = vpop.f32.mrb[32].mxu0 }
0x14aa   :  { %v5689_v37 = vadd.f32 %v6483_v51, %v6117_v31  ;;  %v5683_v38 = vpop.f32.mrb[33].mxu0 }
0x14ab   :  { %v5684_v17 = vadd.f32 %v6117_v31, %v5683_v38 }
0x14ac   :  { %v5693_v20 = vadd.f32 %v5689_v37, %v7437_v58 }
0x14ad   :  { %v5692_v25 = vadd.f32 %v5684_v17, %v7435_v34  ;;  %v5738_v34 = vld [vmem:[%s7905_s8] sm:$0xff] }
0x14ae   :  { %v5699_v44 = vsel %vm107_vm0, %v5693_v20, 0.0  ;;  %v6570_v63 = vpack.c.bf16 %v5739_v61, %v5738_v34  ;;  %v6125_v17 = vld [vmem:[%s7908_s11] ss:$0 sm:$0xff] }
0x14af   :  { %5700 = vadd.xlane.f32.xlu1 %v5699_v44  ;;  %v5696_v48 = vsel %vm107_vm0, %v5692_v25, 0.0 }
0x14b0   :  { %5697 = vadd.xlane.f32.xlu0 %v5696_v48  ;;  %6571 = vmatprep.subr.bf16.mxu1 %v6570_v63 }
0x14b1   :  { %6573 = vmatpush3.bf16.msra.mxu1 %v6570_v63 }
0x14b2   :  { %6575 = vmatprep.subr.bf16.mxu1 %v6574_v5 }
0x14b5   :  { %6577 = vmatpush3.bf16.msra.mxu1 %v6574_v5 }
0x153c   :  { %v5701_v13 = vpop.xlane.xlu1 %5700 }
0x153d   :  { %v5703_v14 = vmul.f32 0.03125, %v5701_v13  ;;  %v5698_v52 = vpop.xlane.xlu0 %5697 }
0x153e   :  { %v5702_v53 = vmul.f32 0.03125, %v5698_v52 }
0x153f   :  { %v5705_v54 = vsub.f32 %v5693_v20, %v5703_v14 }
0x1540   :  { %v5704_v22 = vsub.f32 %v5692_v25, %v5702_v53 }
0x1541   :  { %v5707_v57 = vmul.f32 %v5705_v54, %v5705_v54 }
0x1542   :  { %v5706_v55 = vmul.f32 %v5704_v22, %v5704_v22 }
0x1543   :  { %v5711_v58 = vsel %vm107_vm0, %v5707_v57, 0.0 }
0x1544   :  { %v5708_v43 = vsel %vm107_vm0, %v5706_v55, 0.0 }
0x1545   :  { %5709 = vadd.xlane.f32.xlu0 %v5708_v43 }
0x1549   :  { %5712 = vadd.xlane.f32.xlu0 %v5711_v58 }
0x15d2   :  { %v5710_v59 = vpop.xlane.xlu0 %5709 }
0x15d3   :  { %v5714_v39 = vmul.f32 0.03125, %v5710_v59 }
0x15d5   :  { %v5716_v42 = vadd.f32 1e-05, %v5714_v39 }
0x15d6   :  { %v5713_v45 = vpop.xlane.xlu0 %5712 }
0x15d7   :  { %6693 = vrsqrt.f32 %v5716_v42  ;;  %v5715_v49 = vmul.f32 0.03125, %v5713_v45 }
0x15d9   :  { %v5717_v12 = vadd.f32 1e-05, %v5715_v49 }
0x15db   :  { %6695 = vrsqrt.f32 %v5717_v12  ;;  %v6128_v12 = vld [vmem:[%s7909_s12] ss:$0 sm:$0xff] }
0x15e1   :  { %v6694_v3 = vpop.eup %6693 }
0x15e2   :  { %v5720_v7 = vmul.f32 %v6694_v3, %v5704_v22 }
0x15e4   :  { %v5728_v9 = vmul.f32 %v6120_v6, %v5720_v7 }
0x15e5   :  { %v6696_v62 = vpop.eup %6695 }
0x15e6   :  { %v5721_v15 = vmul.f32 %v6696_v62, %v5705_v54  ;;  %v5736_v16 = vadd.f32 %v6121_v8, %v5728_v9 }
0x15e8   :  { %v5729_v46 = vmul.f32 %v6120_v6, %v5721_v15  ;;  %6492 = vmatprep.mubr.msk.f32.mxu1 %vm107_vm0, %v5736_v16 }
0x15ea   :  { %v5737_v18 = vadd.f32 %v6121_v8, %v5729_v46  ;;  %v6129_v8 = vld [vmem:[%s7910_s13] ss:$0 sm:$0xff] }
0x15ec   :  { %6493 = vmatmul.mubr.msk.f32.vlgmr.msra.gmra.mrb[42].mxu1 %vm107_vm0, %v5737_v18 }
0x16bf   :  { %v6494_v33 = vpop.f32.mrb[42].mxu1 }
0x16c0   :  { %v5827_v35 = vadd.f32 %v6494_v33, %v6122_v60  ;;  %v5821_v36 = vpop.f32.mrb[43].mxu1 }
0x16c1   :  { %v5822_v11 = vadd.f32 %v6122_v60, %v5821_v36 }
0x16c2   :  { %v5833_v24 = vmul.f32 0.70710677, %v5827_v35  ;;  %v5831_v51 = vmul.f32 0.5, %v5827_v35 }
0x16c3   :  { %v5832_v40 = vmul.f32 0.70710677, %v5822_v11  ;;  %v5830_v47 = vmul.f32 0.5, %v5822_v11 }
0x16c4   :  { %6697 = verf.f32 %v5833_v24 }
0x16c5   :  { %6699 = verf.f32 %v5832_v40 }
0x16ce   :  { %v6698_v41 = vpop.eup %6697 }
0x16cf   :  { %v6700_v19 = vpop.eup %6699  ;;  %v5837_v50 = vadd.f32 1.0, %v6698_v41 }
0x16d0   :  { %v5836_v31 = vadd.f32 1.0, %v6700_v19 }
0x16d1   :  { %v5839_v38 = vmul.f32 %v5837_v50, %v5831_v51 }
0x16d2   :  { %v5838_v37 = vmul.f32 %v5836_v31, %v5830_v47 }
0x16d4   :  { %6511 = vmatprep.mubr.msk.f32.mxu0 %vm2914_vm5, %v5838_v37 }
0x16d5   :  { %6512 = vmatmul.mubr.msk.f32.vlgmr.msra.gmra.mrb[34].mxu0 %vm2914_vm5, %v5839_v38 }
0x17a8   :  { %v6513_v20 = vpop.f32.mrb[34].mxu0 }
0x17a9   :  { %v5933_v25 = vadd.f32 %v6513_v20, %v6125_v17  ;;  %v5927_v44 = vpop.f32.mrb[35].mxu0 }
0x17aa   :  { %v5928_v48 = vadd.f32 %v6125_v17, %v5927_v44 }
0x17ab   :  { %v5937_v13 = vadd.f32 %v5933_v25, %v5737_v18 }
0x17ac   :  { %v5936_v14 = vadd.f32 %v5928_v48, %v5736_v16 }
0x17ad   :  { %v5943_v52 = vsel %vm107_vm0, %v5937_v13, 0.0 }
0x17ae   :  { %5944 = vadd.xlane.f32.xlu0 %v5943_v52  ;;  %v5940_v53 = vsel %vm107_vm0, %v5936_v14, 0.0 }
0x17af   :  { %5941 = vadd.xlane.f32.xlu1 %v5940_v53 }
0x183b   :  { %v5945_v54 = vpop.xlane.xlu0 %5944 }
0x183c   :  { %v5947_v22 = vmul.f32 0.03125, %v5945_v54  ;;  %v5942_v55 = vpop.xlane.xlu1 %5941 }
0x183d   :  { %v5946_v43 = vmul.f32 0.03125, %v5942_v55 }
0x183e   :  { %v5949_v57 = vsub.f32 %v5937_v13, %v5947_v22 }
0x183f   :  { %v5948_v58 = vsub.f32 %v5936_v14, %v5946_v43 }
0x1840   :  { %v5951_v34 = vmul.f32 %v5949_v57, %v5949_v57 }
0x1841   :  { %v5950_v61 = vmul.f32 %v5948_v58, %v5948_v58 }
0x1842   :  { %v5955_v63 = vsel %vm107_vm0, %v5951_v34, 0.0 }
0x1843   :  { %5956 = vadd.xlane.f32.xlu0 %v5955_v63  ;;  %v5952_v4 = vsel %vm107_vm0, %v5950_v61, 0.0 }
0x1844   :  { %5953 = vadd.xlane.f32.xlu1 %v5952_v4 }
0x18d0   :  { %v5957_v0 = vpop.xlane.xlu0 %5956 }
0x18d1   :  { %v5959_v5 = vmul.f32 0.03125, %v5957_v0  ;;  %v5954_v59 = vpop.xlane.xlu1 %5953 }
0x18d2   :  { %v5958_v39 = vmul.f32 0.03125, %v5954_v59 }
0x18d3   :  { %v5961_v42 = vadd.f32 1e-05, %v5959_v5 }
0x18d4   :  { %v5960_v45 = vadd.f32 1e-05, %v5958_v39 }
0x18d5   :  { %6701 = vrsqrt.f32 %v5961_v42 }
0x18d6   :  { %6703 = vrsqrt.f32 %v5960_v45 }
0x18df   :  { %v6702_v49 = vpop.eup %6701 }
0x18e0   :  { %v6704_v3 = vpop.eup %6703  ;;  %v5965_v6 = vmul.f32 %v6702_v49, %v5949_v57 }
0x18e1   :  { %v5964_v7 = vmul.f32 %v6704_v3, %v5948_v58 }
0x18e2   :  { %v5973_v9 = vmul.f32 %v6128_v12, %v5965_v6 }
0x18e3   :  { %v5972_v62 = vmul.f32 %v6128_v12, %v5964_v7 }
0x18e4   :  { %v5981_v15 = vadd.f32 %v6129_v8, %v5973_v9 }
0x18e5   :  { %v5980_v16 = vadd.f32 %v6129_v8, %v5972_v62 }
0x18e6   :  { %5983 = vst.msk [vmem:[#allocation8 + $0x8] sm:$0xff] %vm107_vm0, %v5981_v15 }
0x18e7   :  { %5982 = vst.msk [vmem:[#allocation8] sm:$0xff] %vm107_vm0, %v5980_v16 }
0x18e8   :  { %6784 = shalt.err (!%p6781_p0)
}
0x18e9   :  { %s6785_s2 = scalar_lea.hbm %s7911_s14, 256 }
0x18ea   :  { %p6786_p1 = scmp.ne.s32.totalorder %s7911_s14, %s6785_s2  ;;  %p6789_p2 = scmp.lt.u32.totalorder %s6785_s2, %s7911_s14 }
0x18ec   :  { %p6791_p3 = pnand %p6789_p2, %p6786_p1 }
0x18ee   :  { %6794 = shalt.err (!%p6791_p3)
}
0x18ef   :  { %s7919_s3 = smov 128  }
0x18f0   :  { %5995 = dma.vmem_to_hbm [thread:$0]  %s5990_s28, 256, %s7911_s14, [#allocation4], %s7919_s3, %s7919_s3, %s7918_s15  }
0x18f1   :  { %6799 = dma.done.wait [#allocation4], 256  }
0x18f2   :  { %6800 = vsyncadd [#allocation4], 4294967040 }
0x18f3   :  { %5999 = vsyncpa [#allocation3], 1 }
0x18f4   :  { %6000 = vsyncpa [#allocation6], 1 }
0x18f5   :  { %6001 = vsyncpa [#allocation4], 1 }

</bundles_post_ra>
